<compile_context>
chip_gen: v5e
topology: v5e:2x2
jax: 0.10.0
libtpu: 0.0.40
codegen_flags: <defaults>
</compile_context>

<pallas_src>
import math

import numpy as np
import jax
import jax.numpy as jnp
from jax.experimental import pallas as pl
from jax.experimental.pallas import tpu as pltpu

# ---- small, forward-consistent config (stand-in for roberta-base config) ----
VOCAB = 100
MAX_POS = 64
TYPE_VOCAB = 1
HIDDEN = 64                 # HIDDEN_SIZE
NUM_HEADS = 4
HEAD_DIM = HIDDEN // NUM_HEADS          # 16
INTERMEDIATE = 128
SEQ = 8
BATCH = 2
TOKENS = BATCH * SEQ                    # 16 tokens per problem
NUM_CLASSES = 3
PAD_IDX = 1
LN_EPS = 1e-5                           # RobertaConfig default layer_norm_eps
NPROB = 8                               # independent problems per pallas_call

NT = NUM_HEADS * TOKENS                 # 64 (== HIDDEN for this config; needed
                                        # so the attention masks fit the width-64 table)
NEG = -1e9
_INV_SQRT2 = 0.7071067811865476

# ---------------- packed-operand layouts ----------------
# `tab64` (TAB_ROWS, HIDDEN) f32 : everything that is 64 lanes wide.
WORD_OFF = 0                          # [0:100)   word embeddings (PAD row zeroed)
POS_OFF = 104                         # [104:168) position emb (+ token-type-0 folded in)
WO2_OFF = POS_OFF + MAX_POS           # [168:296) FFN output weight (INTERMEDIATE, HIDDEN)
BD_OFF = WO2_OFF + INTERMEDIATE       # [296:360) 0/1 head-block mask for K/V  (NT, HIDDEN)
SEG_OFF = BD_OFF + NT                 # [360:424) 0/1 head-segment ones (NT, NT)
AMASK_OFF = SEG_OFF + NT              # [424:440) additive batch mask (TOKENS, NT), 0/-1e9
VEC_OFF = AMASK_OFF + TOKENS          # [440:448) ln_eg, ln_eb, ln_ag, ln_ab, ln_og,
TAB_ROWS = VEC_OFF + 8                #           ln_ob, attn_out_bias, ffn_out_bias

# `wbig` (WB_ROWS, WB_COLS) f32 : weight slab, every block at a 128-lane multiple.
# Row HIDDEN holds the matching bias rows at the same column offsets.
Q_OFF = 0                             # wq * 1/sqrt(head_dim)
K_OFF = 128
V_OFF = 256
QKV_W = 384                           # fused QKV matmul spans cols [0:384)
WO_OFF = 384
WI_OFF = 512
WCLS_OFF = 640
WB_COLS = 768
WB_ROWS = 72                          # rows [0:64) weights, row 64 biases, padded to 8


def _gelu_exact(x):
    # HF "gelu" (erf based)
    return 0.5 * x * (1.0 + jax.lax.erf(x * _INV_SQRT2))


# =====================================================================
# Kernel
# =====================================================================
def ensembler_kernel(ids_ref, pos_ref, tab_ref, wbig_ref, ins_ref, out_ref, x_scr):
    p = pl.program_id(0)

    # ---- fused RoBERTa embedding gather: word row + (pos + type) row per token ----
    for t in range(TOKENS):
        wid = ids_ref[p, t]
        pid = pos_ref[p, t]
        x_scr[t:t + 1, :] = (tab_ref[pl.ds(wid, 1), :]
                             + tab_ref[pl.ds(POS_OFF + pid, 1), :])
    x = x_scr[...]                                               # (T, H)

    def layernorm(y, row):
        g = tab_ref[VEC_OFF + row:VEC_OFF + row + 1, :]
        b = tab_ref[VEC_OFF + row + 1:VEC_OFF + row + 2, :]
        mu = jnp.mean(y, axis=-1, keepdims=True)
        d = y - mu
        var = jnp.mean(d * d, axis=-1, keepdims=True)
        return d * jax.lax.rsqrt(var + LN_EPS) * g + b

    h0 = layernorm(x, 0)

    # ---- fused QKV projection (1/sqrt(head_dim) pre-folded into the Q block) ----
    qkv = (jnp.dot(h0, wbig_ref[0:HIDDEN, 0:QKV_W],
                   preferred_element_type=jnp.float32)
           + wbig_ref[HIDDEN:HIDDEN + 1, 0:QKV_W])               # (T, 384)
    qa = qkv[:, Q_OFF:Q_OFF + HIDDEN]                            # 128-aligned slices
    ka = qkv[:, K_OFF:K_OFF + HIDDEN]
    va = qkv[:, V_OFF:V_OFF + HIDDEN]

    # ---- all heads at once via block-diagonal K / V (no per-head loop) ----
    bd = tab_ref[BD_OFF:BD_OFF + NT, :]                          # (NT, H) 0/1
    k_bd = jnp.concatenate([ka] * NUM_HEADS, axis=0) * bd        # (NT, H)
    v_bd = jnp.concatenate([va] * NUM_HEADS, axis=0) * bd        # (NT, H)

    # scores[t, h*T + j] = sum_d Q[t, h*hd+d] * K[j, h*hd+d]
    s = jnp.einsum('td,cd->tc', qa, k_bd,
                   preferred_element_type=jnp.float32)           # (T, NT)
    s = s + tab_ref[AMASK_OFF:AMASK_OFF + TOKENS, :]             # batch separation
    s = s - jnp.max(s, axis=-1, keepdims=True)                   # >= every segment max
    e = jnp.exp(s)
    # per-(row, head) denominators, broadcast across each head block, via one matmul
    denom = jnp.dot(e, tab_ref[SEG_OFF:SEG_OFF + NT, :],
                    preferred_element_type=jnp.float32)          # (T, NT)
    probs = e * pl.reciprocal(jnp.maximum(denom, 1e-30), approx=True)
    ctx = jnp.dot(probs, v_bd, preferred_element_type=jnp.float32)   # (T, H)

    attn = (jnp.dot(ctx, wbig_ref[0:HIDDEN, WO_OFF:WO_OFF + HIDDEN],
                    preferred_element_type=jnp.float32)
            + tab_ref[VEC_OFF + 6:VEC_OFF + 7, :])               # + attn-out bias
    h1 = layernorm(attn + h0, 2)

    # ---- FFN ----
    inter = _gelu_exact(
        jnp.dot(h1, wbig_ref[0:HIDDEN, WI_OFF:WI_OFF + INTERMEDIATE],
                preferred_element_type=jnp.float32)
        + wbig_ref[HIDDEN:HIDDEN + 1, WI_OFF:WI_OFF + INTERMEDIATE])
    ffn = (jnp.dot(inter, tab_ref[WO2_OFF:WO2_OFF + INTERMEDIATE, :],
                   preferred_element_type=jnp.float32)
           + tab_ref[VEC_OFF + 7:VEC_OFF + 8, :])                # + ffn-out bias
    h2 = layernorm(ffn + h1, 4)

    # ---- classifier on all token rows (extra rows are free on the MXU) ----
    wfull = (jnp.dot(h2, wbig_ref[0:HIDDEN, WCLS_OFF:WCLS_OFF + NUM_CLASSES],
                     preferred_element_type=jnp.float32)
             + wbig_ref[HIDDEN:HIDDEN + 1, WCLS_OFF:WCLS_OFF + NUM_CLASSES])  # (T, 3)
    wsel = jnp.concatenate([wfull[b * SEQ:b * SEQ + 1, :] for b in range(BATCH)],
                           axis=0)                               # (B, 3) CLS rows

    out_ref[0] = (wsel[:, 0:1] * ins_ref[0]
                  + wsel[:, 1:2] * ins_ref[1]
                  + wsel[:, 2:3] * ins_ref[2])


# =====================================================================
# Parameter construction / packing
# =====================================================================
def make_params(key):
    ks = list(jax.random.split(key, 24))

    def nrm(shape, std=0.02):
        return (std * jax.random.normal(ks.pop(), shape)).astype(jnp.float32)

    p = {}
    word_emb = nrm((VOCAB, HIDDEN))
    p['word_emb'] = word_emb.at[PAD_IDX].set(0.0)     # padding_idx zeroed
    p['pos_emb'] = nrm((MAX_POS, HIDDEN))
    p['type_emb'] = nrm((TYPE_VOCAB, HIDDEN))
    p['ln_eg'] = 1.0 + nrm((1, HIDDEN)); p['ln_eb'] = nrm((1, HIDDEN))

    p['wq'] = nrm((HIDDEN, HIDDEN)); p['bq'] = nrm((1, HIDDEN))
    p['wk'] = nrm((HIDDEN, HIDDEN)); p['bk'] = nrm((1, HIDDEN))
    p['wv'] = nrm((HIDDEN, HIDDEN)); p['bv'] = nrm((1, HIDDEN))
    p['wo'] = nrm((HIDDEN, HIDDEN)); p['bo'] = nrm((1, HIDDEN))
    p['ln_ag'] = 1.0 + nrm((1, HIDDEN)); p['ln_ab'] = nrm((1, HIDDEN))

    p['wi'] = nrm((HIDDEN, INTERMEDIATE)); p['bi'] = nrm((1, INTERMEDIATE))
    p['wo2'] = nrm((INTERMEDIATE, HIDDEN)); p['bo2'] = nrm((1, HIDDEN))
    p['ln_og'] = 1.0 + nrm((1, HIDDEN)); p['ln_ob'] = nrm((1, HIDDEN))

    p['wcls'] = nrm((HIDDEN, NUM_CLASSES)); p['bcls'] = nrm((1, NUM_CLASSES))
    return p


def pack_params(params):
    """One-time packing of weights + trace-time constants into two VMEM slabs."""
    scale = 1.0 / math.sqrt(HEAD_DIM)

    tab = np.zeros((TAB_ROWS, HIDDEN), np.float32)
    tab[WORD_OFF:WORD_OFF + VOCAB] = np.asarray(params['word_emb'])
    tab[POS_OFF:POS_OFF + MAX_POS] = (np.asarray(params['pos_emb'])
                                      + np.asarray(params['type_emb'][0:1]))
    tab[WO2_OFF:WO2_OFF + INTERMEDIATE] = np.asarray(params['wo2'])

    a = np.arange(NT)[:, None]
    h = np.arange(HIDDEN)[None, :]
    c = np.arange(NT)[None, :]
    q = np.arange(TOKENS)[:, None]
    tab[BD_OFF:BD_OFF + NT] = (a // TOKENS == h // HEAD_DIM).astype(np.float32)
    tab[SEG_OFF:SEG_OFF + NT] = (a // TOKENS == c // TOKENS).astype(np.float32)
    tab[AMASK_OFF:AMASK_OFF + TOKENS] = np.where(
        q // SEQ == (c % TOKENS) // SEQ, 0.0, NEG).astype(np.float32)

    tab[VEC_OFF + 0] = np.asarray(params['ln_eg'][0])
    tab[VEC_OFF + 1] = np.asarray(params['ln_eb'][0])
    tab[VEC_OFF + 2] = np.asarray(params['ln_ag'][0])
    tab[VEC_OFF + 3] = np.asarray(params['ln_ab'][0])
    tab[VEC_OFF + 4] = np.asarray(params['ln_og'][0])
    tab[VEC_OFF + 5] = np.asarray(params['ln_ob'][0])
    tab[VEC_OFF + 6] = np.asarray(params['bo'][0])
    tab[VEC_OFF + 7] = np.asarray(params['bo2'][0])

    wb = np.zeros((WB_ROWS, WB_COLS), np.float32)
    wb[0:HIDDEN, Q_OFF:Q_OFF + HIDDEN] = np.asarray(params['wq']) * scale
    wb[0:HIDDEN, K_OFF:K_OFF + HIDDEN] = np.asarray(params['wk'])
    wb[0:HIDDEN, V_OFF:V_OFF + HIDDEN] = np.asarray(params['wv'])
    wb[0:HIDDEN, WO_OFF:WO_OFF + HIDDEN] = np.asarray(params['wo'])
    wb[0:HIDDEN, WI_OFF:WI_OFF + INTERMEDIATE] = np.asarray(params['wi'])
    wb[0:HIDDEN, WCLS_OFF:WCLS_OFF + NUM_CLASSES] = np.asarray(params['wcls'])
    wb[HIDDEN, Q_OFF:Q_OFF + HIDDEN] = np.asarray(params['bq'][0]) * scale
    wb[HIDDEN, K_OFF:K_OFF + HIDDEN] = np.asarray(params['bk'][0])
    wb[HIDDEN, V_OFF:V_OFF + HIDDEN] = np.asarray(params['bv'][0])
    wb[HIDDEN, WI_OFF:WI_OFF + INTERMEDIATE] = np.asarray(params['bi'][0])
    wb[HIDDEN, WCLS_OFF:WCLS_OFF + NUM_CLASSES] = np.asarray(params['bcls'][0])

    return jnp.asarray(tab), jnp.asarray(wb)


# =====================================================================
# Wrapper (batched over NPROB independent problems)
# =====================================================================
def ensembler_forward(tab64, wbig, input_ids, input1, input2, input3):
    """input_ids: (nprob, B, S) int32; input1/2/3: (nprob, B, 3) f32."""
    nprob = input_ids.shape[0]
    # RoBERTa position ids: cumsum over the non-pad mask (cheap scalar-side XLA).
    mask = (input_ids != PAD_IDX).astype(jnp.int32)
    pos_ids = jnp.cumsum(mask, axis=-1) * mask + PAD_IDX
    ids_flat = input_ids.reshape(nprob, TOKENS).astype(jnp.int32)
    pos_flat = pos_ids.reshape(nprob, TOKENS).astype(jnp.int32)
    ins = jnp.stack([input1, input2, input3], axis=1).reshape(
        nprob * 3, BATCH, NUM_CLASSES).astype(jnp.float32)

    grid_spec = pltpu.PrefetchScalarGridSpec(
        num_scalar_prefetch=2,                     # ids, pos ids -> SMEM
        grid=(nprob,),
        in_specs=[
            # constant-index blocks: DMA'd once, VMEM-resident for every step
            pl.BlockSpec((TAB_ROWS, HIDDEN), lambda p, ids, pos: (0, 0)),
            pl.BlockSpec((WB_ROWS, WB_COLS), lambda p, ids, pos: (0, 0)),
            # per-problem ensemble inputs
            pl.BlockSpec((3, BATCH, NUM_CLASSES), lambda p, ids, pos: (p, 0, 0)),
        ],
        out_specs=pl.BlockSpec((1, BATCH, NUM_CLASSES), lambda p, ids, pos: (p, 0, 0)),
        scratch_shapes=[pltpu.VMEM((TOKENS, HIDDEN), jnp.float32)],
    )
    return pl.pallas_call(
        ensembler_kernel,
        out_shape=jax.ShapeDtypeStruct((nprob, BATCH, NUM_CLASSES), jnp.float32),
        grid_spec=grid_spec,
        compiler_params=pltpu.CompilerParams(
            dimension_semantics=("parallel",)),    # v7x: split grid across 2 TCs
    )(ids_flat, pos_flat, tab64, wbig, ins)


ensembler_forward_jit = jax.jit(ensembler_forward)


# =====================================================================
# Pure-JAX reference (single problem), for verification
# =====================================================================
def roberta_embedding_sum(params, input_ids):
    mask = (input_ids != PAD_IDX).astype(jnp.int32)
    pos_ids = jnp.cumsum(mask, axis=1) * mask + PAD_IDX
    token_type_ids = jnp.zeros_like(input_ids)
    emb = (params['word_emb'][input_ids]
           + params['pos_emb'][pos_ids]
           + params['type_emb'][token_type_ids])
    return emb.astype(jnp.float32)                   # (B, S, H), pre-LayerNorm


def reference_forward(params, input_ids, input1, input2, input3):
    def ln(x, g, b):
        mu = jnp.mean(x, axis=-1, keepdims=True)
        var = jnp.mean(jnp.square(x - mu), axis=-1, keepdims=True)
        return (x - mu) * jax.lax.rsqrt(var + LN_EPS) * g + b

    emb = roberta_embedding_sum(params, input_ids)
    h0 = ln(emb, params['ln_eg'], params['ln_eb'])
    q = jnp.einsum('bsh,hd->bsd', h0, params['wq']) + params['bq']
    k = jnp.einsum('bsh,hd->bsd', h0, params['wk']) + params['bk']
    v = jnp.einsum('bsh,hd->bsd', h0, params['wv']) + params['bv']
    qh = q.reshape(BATCH, SEQ, NUM_HEADS, HEAD_DIM)
    kh = k.reshape(BATCH, SEQ, NUM_HEADS, HEAD_DIM)
    vh = v.reshape(BATCH, SEQ, NUM_HEADS, HEAD_DIM)
    scores = jnp.einsum('bqnd,bknd->bnqk', qh, kh) / math.sqrt(HEAD_DIM)
    probs = jax.nn.softmax(scores, axis=-1)
    ctx = jnp.einsum('bnqk,bknd->bqnd', probs, vh).reshape(BATCH, SEQ, HIDDEN)
    attn = jnp.einsum('bsh,hd->bsd', ctx, params['wo']) + params['bo']
    h1 = ln(attn + h0, params['ln_ag'], params['ln_ab'])
    inter = _gelu_exact(jnp.einsum('bsh,hi->bsi', h1, params['wi']) + params['bi'])
    ffn = jnp.einsum('bsi,ih->bsh', inter, params['wo2']) + params['bo2']
    h2 = ln(ffn + h1, params['ln_og'], params['ln_ob'])
    w = h2[:, 0, :] @ params['wcls'] + params['bcls']
    return w[:, 0:1] * input1 + w[:, 1:2] * input2 + w[:, 2:3] * input3


if __name__ == "__main__":
    key = jax.random.PRNGKey(0)
    k_param, k_ids, k1, k2, k3 = jax.random.split(key, 5)

    params = make_params(k_param)
    tab64, wbig = pack_params(params)

    input_ids = jax.random.randint(k_ids, (NPROB, BATCH, SEQ), 0, VOCAB,
                                   dtype=jnp.int32)
    input1 = jax.random.normal(k1, (NPROB, BATCH, NUM_CLASSES), jnp.float32)
    input2 = jax.random.normal(k2, (NPROB, BATCH, NUM_CLASSES), jnp.float32)
    input3 = jax.random.normal(k3, (NPROB, BATCH, NUM_CLASSES), jnp.float32)

    out = ensembler_forward_jit(tab64, wbig, input_ids, input1, input2, input3)
    out = jax.block_until_ready(out)

    ref = jnp.stack([
        reference_forward(params, input_ids[p], input1[p], input2[p], input3[p])
        for p in range(NPROB)])

    assert out.shape == (NPROB, BATCH, NUM_CLASSES)
    # 2e-3 tolerance: pl.reciprocal(approx=True) in the softmax contributes
    # ~2^-12 relative error; everything else is fp32-rounding level.
    assert jnp.allclose(out, ref, rtol=2e-3, atol=2e-3), (out, ref)

    print("KERNEL_OK")
</pallas_src>

<mosaic_0001>
module attributes {stable_mosaic.version = 11 : i64} {
  func.func @ensembler_kernel(%arg0: i32, %arg1: memref<8x16xi32, #tpu.memory_space<smem>>, %arg2: memref<8x16xi32, #tpu.memory_space<smem>>, %arg3: memref<448x64xf32, #tpu.memory_space<vmem>>, %arg4: memref<72x768xf32, #tpu.memory_space<vmem>>, %arg5: memref<3x2x3xf32, #tpu.memory_space<vmem>>, %arg6: memref<1x2x3xf32, #tpu.memory_space<vmem>>, %arg7: memref<16x64xf32, #tpu.memory_space<vmem>>) attributes {dimension_semantics = [#tpu.dimension_semantics<parallel>], iteration_bounds = array<i64: 8>, scalar_prefetch = 2 : i64, scratch_operands = 1 : i64, tpu.core_type = #tpu.core_type<tc>, window_params = [{pipeline_mode = #tpu.pipeline_mode<synchronous>, transform_indices = @transform_0, window_bounds = array<i64: 448, 64>}, {pipeline_mode = #tpu.pipeline_mode<synchronous>, transform_indices = @transform_1, window_bounds = array<i64: 72, 768>}, {transform_indices = @transform_2, window_bounds = array<i64: 3, 2, 3>}, {transform_indices = @transform_3, window_bounds = array<i64: 1, 2, 3>}]} {
    %0 = arith.index_cast %arg0 : i32 to index
    %c0 = arith.constant 0 : index
    %1 = memref.load %arg1[%0, %c0] : memref<8x16xi32, #tpu.memory_space<smem>>
    %2 = arith.index_cast %arg0 : i32 to index
    %c0_0 = arith.constant 0 : index
    %3 = memref.load %arg2[%2, %c0_0] : memref<8x16xi32, #tpu.memory_space<smem>>
    %4 = arith.index_cast %1 : i32 to index
    %c0_1 = arith.constant 0 : index
    %5 = vector.load %arg3[%4, %c0_1] : memref<448x64xf32, #tpu.memory_space<vmem>>, vector<1x64xf32>
    %c104_i32 = arith.constant 104 : i32
    %6 = arith.addi %c104_i32, %3 : i32
    %7 = arith.index_cast %6 : i32 to index
    %c0_2 = arith.constant 0 : index
    %8 = vector.load %arg3[%7, %c0_2] : memref<448x64xf32, #tpu.memory_space<vmem>>, vector<1x64xf32>
    %9 = arith.addf %5, %8 : vector<1x64xf32>
    %c0_3 = arith.constant 0 : index
    %c0_4 = arith.constant 0 : index
    %10 = vector.load %arg7[%c0_3, %c0_4] : memref<16x64xf32, #tpu.memory_space<vmem>>, vector<1x64xf32>
    tpu.vector_store %arg7[%c0_3, %c0_4], %9 {strides = array<i32>} : memref<16x64xf32, #tpu.memory_space<vmem>>, vector<1x64xf32>,
    %11 = arith.index_cast %arg0 : i32 to index
    %c1 = arith.constant 1 : index
    %12 = memref.load %arg1[%11, %c1] : memref<8x16xi32, #tpu.memory_space<smem>>
    %13 = arith.index_cast %arg0 : i32 to index
    %c1_5 = arith.constant 1 : index
    %14 = memref.load %arg2[%13, %c1_5] : memref<8x16xi32, #tpu.memory_space<smem>>
    %15 = arith.index_cast %12 : i32 to index
    %c0_6 = arith.constant 0 : index
    %16 = vector.load %arg3[%15, %c0_6] : memref<448x64xf32, #tpu.memory_space<vmem>>, vector<1x64xf32>
    %c104_i32_7 = arith.constant 104 : i32
    %17 = arith.addi %c104_i32_7, %14 : i32
    %18 = arith.index_cast %17 : i32 to index
    %c0_8 = arith.constant 0 : index
    %19 = vector.load %arg3[%18, %c0_8] : memref<448x64xf32, #tpu.memory_space<vmem>>, vector<1x64xf32>
    %20 = arith.addf %16, %19 : vector<1x64xf32>
    %c1_9 = arith.constant 1 : index
    %c0_10 = arith.constant 0 : index
    %21 = vector.load %arg7[%c1_9, %c0_10] : memref<16x64xf32, #tpu.memory_space<vmem>>, vector<1x64xf32>
    tpu.vector_store %arg7[%c1_9, %c0_10], %20 {strides = array<i32>} : memref<16x64xf32, #tpu.memory_space<vmem>>, vector<1x64xf32>,
    %22 = arith.index_cast %arg0 : i32 to index
    %c2 = arith.constant 2 : index
    %23 = memref.load %arg1[%22, %c2] : memref<8x16xi32, #tpu.memory_space<smem>>
    %24 = arith.index_cast %arg0 : i32 to index
    %c2_11 = arith.constant 2 : index
    %25 = memref.load %arg2[%24, %c2_11] : memref<8x16xi32, #tpu.memory_space<smem>>
    %26 = arith.index_cast %23 : i32 to index
    %c0_12 = arith.constant 0 : index
    %27 = vector.load %arg3[%26, %c0_12] : memref<448x64xf32, #tpu.memory_space<vmem>>, vector<1x64xf32>
    %c104_i32_13 = arith.constant 104 : i32
    %28 = arith.addi %c104_i32_13, %25 : i32
    %29 = arith.index_cast %28 : i32 to index
    %c0_14 = arith.constant 0 : index
    %30 = vector.load %arg3[%29, %c0_14] : memref<448x64xf32, #tpu.memory_space<vmem>>, vector<1x64xf32>
    %31 = arith.addf %27, %30 : vector<1x64xf32>
    %c2_15 = arith.constant 2 : index
    %c0_16 = arith.constant 0 : index
    %32 = vector.load %arg7[%c2_15, %c0_16] : memref<16x64xf32, #tpu.memory_space<vmem>>, vector<1x64xf32>
    tpu.vector_store %arg7[%c2_15, %c0_16], %31 {strides = array<i32>} : memref<16x64xf32, #tpu.memory_space<vmem>>, vector<1x64xf32>,
    %33 = arith.index_cast %arg0 : i32 to index
    %c3 = arith.constant 3 : index
    %34 = memref.load %arg1[%33, %c3] : memref<8x16xi32, #tpu.memory_space<smem>>
    %35 = arith.index_cast %arg0 : i32 to index
    %c3_17 = arith.constant 3 : index
    %36 = memref.load %arg2[%35, %c3_17] : memref<8x16xi32, #tpu.memory_space<smem>>
    %37 = arith.index_cast %34 : i32 to index
    %c0_18 = arith.constant 0 : index
    %38 = vector.load %arg3[%37, %c0_18] : memref<448x64xf32, #tpu.memory_space<vmem>>, vector<1x64xf32>
    %c104_i32_19 = arith.constant 104 : i32
    %39 = arith.addi %c104_i32_19, %36 : i32
    %40 = arith.index_cast %39 : i32 to index
    %c0_20 = arith.constant 0 : index
    %41 = vector.load %arg3[%40, %c0_20] : memref<448x64xf32, #tpu.memory_space<vmem>>, vector<1x64xf32>
    %42 = arith.addf %38, %41 : vector<1x64xf32>
    %c3_21 = arith.constant 3 : index
    %c0_22 = arith.constant 0 : index
    %43 = vector.load %arg7[%c3_21, %c0_22] : memref<16x64xf32, #tpu.memory_space<vmem>>, vector<1x64xf32>
    tpu.vector_store %arg7[%c3_21, %c0_22], %42 {strides = array<i32>} : memref<16x64xf32, #tpu.memory_space<vmem>>, vector<1x64xf32>,
    %44 = arith.index_cast %arg0 : i32 to index
    %c4 = arith.constant 4 : index
    %45 = memref.load %arg1[%44, %c4] : memref<8x16xi32, #tpu.memory_space<smem>>
    %46 = arith.index_cast %arg0 : i32 to index
    %c4_23 = arith.constant 4 : index
    %47 = memref.load %arg2[%46, %c4_23] : memref<8x16xi32, #tpu.memory_space<smem>>
    %48 = arith.index_cast %45 : i32 to index
    %c0_24 = arith.constant 0 : index
    %49 = vector.load %arg3[%48, %c0_24] : memref<448x64xf32, #tpu.memory_space<vmem>>, vector<1x64xf32>
    %c104_i32_25 = arith.constant 104 : i32
    %50 = arith.addi %c104_i32_25, %47 : i32
    %51 = arith.index_cast %50 : i32 to index
    %c0_26 = arith.constant 0 : index
    %52 = vector.load %arg3[%51, %c0_26] : memref<448x64xf32, #tpu.memory_space<vmem>>, vector<1x64xf32>
    %53 = arith.addf %49, %52 : vector<1x64xf32>
    %c4_27 = arith.constant 4 : index
    %c0_28 = arith.constant 0 : index
    %54 = vector.load %arg7[%c4_27, %c0_28] : memref<16x64xf32, #tpu.memory_space<vmem>>, vector<1x64xf32>
    tpu.vector_store %arg7[%c4_27, %c0_28], %53 {strides = array<i32>} : memref<16x64xf32, #tpu.memory_space<vmem>>, vector<1x64xf32>,
    %55 = arith.index_cast %arg0 : i32 to index
    %c5 = arith.constant 5 : index
    %56 = memref.load %arg1[%55, %c5] : memref<8x16xi32, #tpu.memory_space<smem>>
    %57 = arith.index_cast %arg0 : i32 to index
    %c5_29 = arith.constant 5 : index
    %58 = memref.load %arg2[%57, %c5_29] : memref<8x16xi32, #tpu.memory_space<smem>>
    %59 = arith.index_cast %56 : i32 to index
    %c0_30 = arith.constant 0 : index
    %60 = vector.load %arg3[%59, %c0_30] : memref<448x64xf32, #tpu.memory_space<vmem>>, vector<1x64xf32>
    %c104_i32_31 = arith.constant 104 : i32
    %61 = arith.addi %c104_i32_31, %58 : i32
    %62 = arith.index_cast %61 : i32 to index
    %c0_32 = arith.constant 0 : index
    %63 = vector.load %arg3[%62, %c0_32] : memref<448x64xf32, #tpu.memory_space<vmem>>, vector<1x64xf32>
    %64 = arith.addf %60, %63 : vector<1x64xf32>
    %c5_33 = arith.constant 5 : index
    %c0_34 = arith.constant 0 : index
    %65 = vector.load %arg7[%c5_33, %c0_34] : memref<16x64xf32, #tpu.memory_space<vmem>>, vector<1x64xf32>
    tpu.vector_store %arg7[%c5_33, %c0_34], %64 {strides = array<i32>} : memref<16x64xf32, #tpu.memory_space<vmem>>, vector<1x64xf32>,
    %66 = arith.index_cast %arg0 : i32 to index
    %c6 = arith.constant 6 : index
    %67 = memref.load %arg1[%66, %c6] : memref<8x16xi32, #tpu.memory_space<smem>>
    %68 = arith.index_cast %arg0 : i32 to index
    %c6_35 = arith.constant 6 : index
    %69 = memref.load %arg2[%68, %c6_35] : memref<8x16xi32, #tpu.memory_space<smem>>
    %70 = arith.index_cast %67 : i32 to index
    %c0_36 = arith.constant 0 : index
    %71 = vector.load %arg3[%70, %c0_36] : memref<448x64xf32, #tpu.memory_space<vmem>>, vector<1x64xf32>
    %c104_i32_37 = arith.constant 104 : i32
    %72 = arith.addi %c104_i32_37, %69 : i32
    %73 = arith.index_cast %72 : i32 to index
    %c0_38 = arith.constant 0 : index
    %74 = vector.load %arg3[%73, %c0_38] : memref<448x64xf32, #tpu.memory_space<vmem>>, vector<1x64xf32>
    %75 = arith.addf %71, %74 : vector<1x64xf32>
    %c6_39 = arith.constant 6 : index
    %c0_40 = arith.constant 0 : index
    %76 = vector.load %arg7[%c6_39, %c0_40] : memref<16x64xf32, #tpu.memory_space<vmem>>, vector<1x64xf32>
    tpu.vector_store %arg7[%c6_39, %c0_40], %75 {strides = array<i32>} : memref<16x64xf32, #tpu.memory_space<vmem>>, vector<1x64xf32>,
    %77 = arith.index_cast %arg0 : i32 to index
    %c7 = arith.constant 7 : index
    %78 = memref.load %arg1[%77, %c7] : memref<8x16xi32, #tpu.memory_space<smem>>
    %79 = arith.index_cast %arg0 : i32 to index
    %c7_41 = arith.constant 7 : index
    %80 = memref.load %arg2[%79, %c7_41] : memref<8x16xi32, #tpu.memory_space<smem>>
    %81 = arith.index_cast %78 : i32 to index
    %c0_42 = arith.constant 0 : index
    %82 = vector.load %arg3[%81, %c0_42] : memref<448x64xf32, #tpu.memory_space<vmem>>, vector<1x64xf32>
    %c104_i32_43 = arith.constant 104 : i32
    %83 = arith.addi %c104_i32_43, %80 : i32
    %84 = arith.index_cast %83 : i32 to index
    %c0_44 = arith.constant 0 : index
    %85 = vector.load %arg3[%84, %c0_44] : memref<448x64xf32, #tpu.memory_space<vmem>>, vector<1x64xf32>
    %86 = arith.addf %82, %85 : vector<1x64xf32>
    %c7_45 = arith.constant 7 : index
    %c0_46 = arith.constant 0 : index
    %87 = vector.load %arg7[%c7_45, %c0_46] : memref<16x64xf32, #tpu.memory_space<vmem>>, vector<1x64xf32>
    tpu.vector_store %arg7[%c7_45, %c0_46], %86 {strides = array<i32>} : memref<16x64xf32, #tpu.memory_space<vmem>>, vector<1x64xf32>,
    %88 = arith.index_cast %arg0 : i32 to index
    %c8 = arith.constant 8 : index
    %89 = memref.load %arg1[%88, %c8] : memref<8x16xi32, #tpu.memory_space<smem>>
    %90 = arith.index_cast %arg0 : i32 to index
    %c8_47 = arith.constant 8 : index
    %91 = memref.load %arg2[%90, %c8_47] : memref<8x16xi32, #tpu.memory_space<smem>>
    %92 = arith.index_cast %89 : i32 to index
    %c0_48 = arith.constant 0 : index
    %93 = vector.load %arg3[%92, %c0_48] : memref<448x64xf32, #tpu.memory_space<vmem>>, vector<1x64xf32>
    %c104_i32_49 = arith.constant 104 : i32
    %94 = arith.addi %c104_i32_49, %91 : i32
    %95 = arith.index_cast %94 : i32 to index
    %c0_50 = arith.constant 0 : index
    %96 = vector.load %arg3[%95, %c0_50] : memref<448x64xf32, #tpu.memory_space<vmem>>, vector<1x64xf32>
    %97 = arith.addf %93, %96 : vector<1x64xf32>
    %c8_51 = arith.constant 8 : index
    %c0_52 = arith.constant 0 : index
    %98 = vector.load %arg7[%c8_51, %c0_52] : memref<16x64xf32, #tpu.memory_space<vmem>>, vector<1x64xf32>
    tpu.vector_store %arg7[%c8_51, %c0_52], %97 {strides = array<i32>} : memref<16x64xf32, #tpu.memory_space<vmem>>, vector<1x64xf32>,
    %99 = arith.index_cast %arg0 : i32 to index
    %c9 = arith.constant 9 : index
    %100 = memref.load %arg1[%99, %c9] : memref<8x16xi32, #tpu.memory_space<smem>>
    %101 = arith.index_cast %arg0 : i32 to index
    %c9_53 = arith.constant 9 : index
    %102 = memref.load %arg2[%101, %c9_53] : memref<8x16xi32, #tpu.memory_space<smem>>
    %103 = arith.index_cast %100 : i32 to index
    %c0_54 = arith.constant 0 : index
    %104 = vector.load %arg3[%103, %c0_54] : memref<448x64xf32, #tpu.memory_space<vmem>>, vector<1x64xf32>
    %c104_i32_55 = arith.constant 104 : i32
    %105 = arith.addi %c104_i32_55, %102 : i32
    %106 = arith.index_cast %105 : i32 to index
    %c0_56 = arith.constant 0 : index
    %107 = vector.load %arg3[%106, %c0_56] : memref<448x64xf32, #tpu.memory_space<vmem>>, vector<1x64xf32>
    %108 = arith.addf %104, %107 : vector<1x64xf32>
    %c9_57 = arith.constant 9 : index
    %c0_58 = arith.constant 0 : index
    %109 = vector.load %arg7[%c9_57, %c0_58] : memref<16x64xf32, #tpu.memory_space<vmem>>, vector<1x64xf32>
    tpu.vector_store %arg7[%c9_57, %c0_58], %108 {strides = array<i32>} : memref<16x64xf32, #tpu.memory_space<vmem>>, vector<1x64xf32>,
    %110 = arith.index_cast %arg0 : i32 to index
    %c10 = arith.constant 10 : index
    %111 = memref.load %arg1[%110, %c10] : memref<8x16xi32, #tpu.memory_space<smem>>
    %112 = arith.index_cast %arg0 : i32 to index
    %c10_59 = arith.constant 10 : index
    %113 = memref.load %arg2[%112, %c10_59] : memref<8x16xi32, #tpu.memory_space<smem>>
    %114 = arith.index_cast %111 : i32 to index
    %c0_60 = arith.constant 0 : index
    %115 = vector.load %arg3[%114, %c0_60] : memref<448x64xf32, #tpu.memory_space<vmem>>, vector<1x64xf32>
    %c104_i32_61 = arith.constant 104 : i32
    %116 = arith.addi %c104_i32_61, %113 : i32
    %117 = arith.index_cast %116 : i32 to index
    %c0_62 = arith.constant 0 : index
    %118 = vector.load %arg3[%117, %c0_62] : memref<448x64xf32, #tpu.memory_space<vmem>>, vector<1x64xf32>
    %119 = arith.addf %115, %118 : vector<1x64xf32>
    %c10_63 = arith.constant 10 : index
    %c0_64 = arith.constant 0 : index
    %120 = vector.load %arg7[%c10_63, %c0_64] : memref<16x64xf32, #tpu.memory_space<vmem>>, vector<1x64xf32>
    tpu.vector_store %arg7[%c10_63, %c0_64], %119 {strides = array<i32>} : memref<16x64xf32, #tpu.memory_space<vmem>>, vector<1x64xf32>,
    %121 = arith.index_cast %arg0 : i32 to index
    %c11 = arith.constant 11 : index
    %122 = memref.load %arg1[%121, %c11] : memref<8x16xi32, #tpu.memory_space<smem>>
    %123 = arith.index_cast %arg0 : i32 to index
    %c11_65 = arith.constant 11 : index
    %124 = memref.load %arg2[%123, %c11_65] : memref<8x16xi32, #tpu.memory_space<smem>>
    %125 = arith.index_cast %122 : i32 to index
    %c0_66 = arith.constant 0 : index
    %126 = vector.load %arg3[%125, %c0_66] : memref<448x64xf32, #tpu.memory_space<vmem>>, vector<1x64xf32>
    %c104_i32_67 = arith.constant 104 : i32
    %127 = arith.addi %c104_i32_67, %124 : i32
    %128 = arith.index_cast %127 : i32 to index
    %c0_68 = arith.constant 0 : index
    %129 = vector.load %arg3[%128, %c0_68] : memref<448x64xf32, #tpu.memory_space<vmem>>, vector<1x64xf32>
    %130 = arith.addf %126, %129 : vector<1x64xf32>
    %c11_69 = arith.constant 11 : index
    %c0_70 = arith.constant 0 : index
    %131 = vector.load %arg7[%c11_69, %c0_70] : memref<16x64xf32, #tpu.memory_space<vmem>>, vector<1x64xf32>
    tpu.vector_store %arg7[%c11_69, %c0_70], %130 {strides = array<i32>} : memref<16x64xf32, #tpu.memory_space<vmem>>, vector<1x64xf32>,
    %132 = arith.index_cast %arg0 : i32 to index
    %c12 = arith.constant 12 : index
    %133 = memref.load %arg1[%132, %c12] : memref<8x16xi32, #tpu.memory_space<smem>>
    %134 = arith.index_cast %arg0 : i32 to index
    %c12_71 = arith.constant 12 : index
    %135 = memref.load %arg2[%134, %c12_71] : memref<8x16xi32, #tpu.memory_space<smem>>
    %136 = arith.index_cast %133 : i32 to index
    %c0_72 = arith.constant 0 : index
    %137 = vector.load %arg3[%136, %c0_72] : memref<448x64xf32, #tpu.memory_space<vmem>>, vector<1x64xf32>
    %c104_i32_73 = arith.constant 104 : i32
    %138 = arith.addi %c104_i32_73, %135 : i32
    %139 = arith.index_cast %138 : i32 to index
    %c0_74 = arith.constant 0 : index
    %140 = vector.load %arg3[%139, %c0_74] : memref<448x64xf32, #tpu.memory_space<vmem>>, vector<1x64xf32>
    %141 = arith.addf %137, %140 : vector<1x64xf32>
    %c12_75 = arith.constant 12 : index
    %c0_76 = arith.constant 0 : index
    %142 = vector.load %arg7[%c12_75, %c0_76] : memref<16x64xf32, #tpu.memory_space<vmem>>, vector<1x64xf32>
    tpu.vector_store %arg7[%c12_75, %c0_76], %141 {strides = array<i32>} : memref<16x64xf32, #tpu.memory_space<vmem>>, vector<1x64xf32>,
    %143 = arith.index_cast %arg0 : i32 to index
    %c13 = arith.constant 13 : index
    %144 = memref.load %arg1[%143, %c13] : memref<8x16xi32, #tpu.memory_space<smem>>
    %145 = arith.index_cast %arg0 : i32 to index
    %c13_77 = arith.constant 13 : index
    %146 = memref.load %arg2[%145, %c13_77] : memref<8x16xi32, #tpu.memory_space<smem>>
    %147 = arith.index_cast %144 : i32 to index
    %c0_78 = arith.constant 0 : index
    %148 = vector.load %arg3[%147, %c0_78] : memref<448x64xf32, #tpu.memory_space<vmem>>, vector<1x64xf32>
    %c104_i32_79 = arith.constant 104 : i32
    %149 = arith.addi %c104_i32_79, %146 : i32
    %150 = arith.index_cast %149 : i32 to index
    %c0_80 = arith.constant 0 : index
    %151 = vector.load %arg3[%150, %c0_80] : memref<448x64xf32, #tpu.memory_space<vmem>>, vector<1x64xf32>
    %152 = arith.addf %148, %151 : vector<1x64xf32>
    %c13_81 = arith.constant 13 : index
    %c0_82 = arith.constant 0 : index
    %153 = vector.load %arg7[%c13_81, %c0_82] : memref<16x64xf32, #tpu.memory_space<vmem>>, vector<1x64xf32>
    tpu.vector_store %arg7[%c13_81, %c0_82], %152 {strides = array<i32>} : memref<16x64xf32, #tpu.memory_space<vmem>>, vector<1x64xf32>,
    %154 = arith.index_cast %arg0 : i32 to index
    %c14 = arith.constant 14 : index
    %155 = memref.load %arg1[%154, %c14] : memref<8x16xi32, #tpu.memory_space<smem>>
    %156 = arith.index_cast %arg0 : i32 to index
    %c14_83 = arith.constant 14 : index
    %157 = memref.load %arg2[%156, %c14_83] : memref<8x16xi32, #tpu.memory_space<smem>>
    %158 = arith.index_cast %155 : i32 to index
    %c0_84 = arith.constant 0 : index
    %159 = vector.load %arg3[%158, %c0_84] : memref<448x64xf32, #tpu.memory_space<vmem>>, vector<1x64xf32>
    %c104_i32_85 = arith.constant 104 : i32
    %160 = arith.addi %c104_i32_85, %157 : i32
    %161 = arith.index_cast %160 : i32 to index
    %c0_86 = arith.constant 0 : index
    %162 = vector.load %arg3[%161, %c0_86] : memref<448x64xf32, #tpu.memory_space<vmem>>, vector<1x64xf32>
    %163 = arith.addf %159, %162 : vector<1x64xf32>
    %c14_87 = arith.constant 14 : index
    %c0_88 = arith.constant 0 : index
    %164 = vector.load %arg7[%c14_87, %c0_88] : memref<16x64xf32, #tpu.memory_space<vmem>>, vector<1x64xf32>
    tpu.vector_store %arg7[%c14_87, %c0_88], %163 {strides = array<i32>} : memref<16x64xf32, #tpu.memory_space<vmem>>, vector<1x64xf32>,
    %165 = arith.index_cast %arg0 : i32 to index
    %c15 = arith.constant 15 : index
    %166 = memref.load %arg1[%165, %c15] : memref<8x16xi32, #tpu.memory_space<smem>>
    %167 = arith.index_cast %arg0 : i32 to index
    %c15_89 = arith.constant 15 : index
    %168 = memref.load %arg2[%167, %c15_89] : memref<8x16xi32, #tpu.memory_space<smem>>
    %169 = arith.index_cast %166 : i32 to index
    %c0_90 = arith.constant 0 : index
    %170 = vector.load %arg3[%169, %c0_90] : memref<448x64xf32, #tpu.memory_space<vmem>>, vector<1x64xf32>
    %c104_i32_91 = arith.constant 104 : i32
    %171 = arith.addi %c104_i32_91, %168 : i32
    %172 = arith.index_cast %171 : i32 to index
    %c0_92 = arith.constant 0 : index
    %173 = vector.load %arg3[%172, %c0_92] : memref<448x64xf32, #tpu.memory_space<vmem>>, vector<1x64xf32>
    %174 = arith.addf %170, %173 : vector<1x64xf32>
    %c15_93 = arith.constant 15 : index
    %c0_94 = arith.constant 0 : index
    %175 = vector.load %arg7[%c15_93, %c0_94] : memref<16x64xf32, #tpu.memory_space<vmem>>, vector<1x64xf32>
    tpu.vector_store %arg7[%c15_93, %c0_94], %174 {strides = array<i32>} : memref<16x64xf32, #tpu.memory_space<vmem>>, vector<1x64xf32>,
    %c0_95 = arith.constant 0 : index
    %c0_96 = arith.constant 0 : index
    %176 = vector.load %arg7[%c0_95, %c0_96] : memref<16x64xf32, #tpu.memory_space<vmem>>, vector<16x64xf32>
    %c440 = arith.constant 440 : index
    %c0_97 = arith.constant 0 : index
    %177 = vector.load %arg3[%c440, %c0_97] : memref<448x64xf32, #tpu.memory_space<vmem>>, vector<1x64xf32>
    %c441 = arith.constant 441 : index
    %c0_98 = arith.constant 0 : index
    %178 = vector.load %arg3[%c441, %c0_98] : memref<448x64xf32, #tpu.memory_space<vmem>>, vector<1x64xf32>
    %cst = arith.constant dense<0.000000e+00> : vector<16xf32>
    %179 = vector.multi_reduction <add>, %176, %cst [1] : vector<16x64xf32> to vector<16xf32>
    %180 = vector.shape_cast %179 : vector<16xf32> to vector<16x1xf32>
    %cst_99 = arith.constant 6.400000e+01 : f32
    %181 = vector.broadcast %cst_99 : f32 to vector<16x1xf32>
    %182 = arith.divf %180, %181 : vector<16x1xf32>
    %183 = vector.broadcast %182 : vector<16x1xf32> to vector<16x64xf32>
    %184 = arith.subf %176, %183 : vector<16x64xf32>
    %185 = arith.mulf %184, %184 : vector<16x64xf32>
    %cst_100 = arith.constant dense<0.000000e+00> : vector<16xf32>
    %186 = vector.multi_reduction <add>, %185, %cst_100 [1] : vector<16x64xf32> to vector<16xf32>
    %187 = vector.shape_cast %186 : vector<16xf32> to vector<16x1xf32>
    %cst_101 = arith.constant 6.400000e+01 : f32
    %188 = vector.broadcast %cst_101 : f32 to vector<16x1xf32>
    %189 = arith.divf %187, %188 : vector<16x1xf32>
    %cst_102 = arith.constant 9.99999974E-6 : f32
    %190 = vector.broadcast %cst_102 : f32 to vector<16x1xf32>
    %191 = arith.addf %189, %190 : vector<16x1xf32>
    %192 = math.rsqrt %191 : vector<16x1xf32>
    %193 = vector.broadcast %192 : vector<16x1xf32> to vector<16x64xf32>
    %194 = arith.mulf %184, %193 : vector<16x64xf32>
    %195 = vector.broadcast %177 : vector<1x64xf32> to vector<16x64xf32>
    %196 = arith.mulf %194, %195 : vector<16x64xf32>
    %197 = vector.broadcast %178 : vector<1x64xf32> to vector<16x64xf32>
    %198 = arith.addf %196, %197 : vector<16x64xf32>
    %c0_103 = arith.constant 0 : index
    %c0_104 = arith.constant 0 : index
    %199 = vector.load %arg4[%c0_103, %c0_104] : memref<72x768xf32, #tpu.memory_space<vmem>>, vector<64x384xf32>
    %cst_105 = arith.constant dense<0.000000e+00> : vector<16x384xf32>
    %200 = tpu.matmul %198, %199, %cst_105 {dimension_numbers = #tpu.dot_dimension_numbers<[1], [0], [0], [1], [0, 0, 1, 1], [], []>} : vector<16x64xf32>, vector<64x384xf32>, vector<16x384xf32> -> vector<16x384xf32>
    %c64 = arith.constant 64 : index
    %c0_106 = arith.constant 0 : index
    %201 = vector.load %arg4[%c64, %c0_106] : memref<72x768xf32, #tpu.memory_space<vmem>>, vector<1x384xf32>
    %202 = vector.broadcast %201 : vector<1x384xf32> to vector<16x384xf32>
    %203 = arith.addf %200, %202 : vector<16x384xf32>
    %204 = vector.extract_strided_slice %203 {offsets = [0, 0], sizes = [16, 64], strides = [1, 1]} : vector<16x384xf32> to vector<16x64xf32>
    %205 = vector.extract_strided_slice %203 {offsets = [0, 128], sizes = [16, 64], strides = [1, 1]} : vector<16x384xf32> to vector<16x64xf32>
    %206 = vector.extract_strided_slice %203 {offsets = [0, 256], sizes = [16, 64], strides = [1, 1]} : vector<16x384xf32> to vector<16x64xf32>
    %c296 = arith.constant 296 : index
    %c0_107 = arith.constant 0 : index
    %207 = vector.load %arg3[%c296, %c0_107] : memref<448x64xf32, #tpu.memory_space<vmem>>, vector<64x64xf32>
    %208 = tpu.concatenate %205, %205, %205, %205 in 0 : vector<16x64xf32>, vector<16x64xf32>, vector<16x64xf32>, vector<16x64xf32> -> vector<64x64xf32>
    %209 = arith.mulf %208, %207 : vector<64x64xf32>
    %210 = tpu.concatenate %206, %206, %206, %206 in 0 : vector<16x64xf32>, vector<16x64xf32>, vector<16x64xf32>, vector<16x64xf32> -> vector<64x64xf32>
    %211 = arith.mulf %210, %207 : vector<64x64xf32>
    "tpu.trace_start"() <{level = 10 : i32, message = "td,cd->tc"}> : () -> ()
    %cst_108 = arith.constant dense<0.000000e+00> : vector<16x64xf32>
    %212 = tpu.matmul %204, %209, %cst_108 {dimension_numbers = #tpu.dot_dimension_numbers<[1], [1], [0], [0], [0, 0, 1, 0], [], []>} : vector<16x64xf32>, vector<64x64xf32>, vector<16x64xf32> -> vector<16x64xf32>
    "tpu.trace_stop"() : () -> ()
    %c424 = arith.constant 424 : index
    %c0_109 = arith.constant 0 : index
    %213 = vector.load %arg3[%c424, %c0_109] : memref<448x64xf32, #tpu.memory_space<vmem>>, vector<16x64xf32>
    %214 = arith.addf %212, %213 : vector<16x64xf32>
    %cst_110 = arith.constant dense<0xFF800000> : vector<16xf32>
    %215 = vector.multi_reduction <maximumf>, %214, %cst_110 [1] : vector<16x64xf32> to vector<16xf32>
    %216 = vector.shape_cast %215 : vector<16xf32> to vector<16x1xf32>
    %217 = vector.broadcast %216 : vector<16x1xf32> to vector<16x64xf32>
    %218 = arith.subf %214, %217 : vector<16x64xf32>
    %219 = math.exp %218 : vector<16x64xf32>
    %c360 = arith.constant 360 : index
    %c0_111 = arith.constant 0 : index
    %220 = vector.load %arg3[%c360, %c0_111] : memref<448x64xf32, #tpu.memory_space<vmem>>, vector<64x64xf32>
    %cst_112 = arith.constant dense<0.000000e+00> : vector<16x64xf32>
    %221 = tpu.matmul %219, %220, %cst_112 {dimension_numbers = #tpu.dot_dimension_numbers<[1], [0], [0], [1], [0, 0, 1, 1], [], []>} : vector<16x64xf32>, vector<64x64xf32>, vector<16x64xf32> -> vector<16x64xf32>
    %cst_113 = arith.constant 1.000000e-30 : f32
    %222 = vector.broadcast %cst_113 : f32 to vector<16x64xf32>
    %223 = arith.maximumf %221, %222 : vector<16x64xf32>
    %224 = tpu.reciprocal %223 {approx = true} : vector<16x64xf32> -> vector<16x64xf32>
    %225 = arith.mulf %219, %224 : vector<16x64xf32>
    %cst_114 = arith.constant dense<0.000000e+00> : vector<16x64xf32>
    %226 = tpu.matmul %225, %211, %cst_114 {dimension_numbers = #tpu.dot_dimension_numbers<[1], [0], [0], [1], [0, 0, 1, 1], [], []>} : vector<16x64xf32>, vector<64x64xf32>, vector<16x64xf32> -> vector<16x64xf32>
    %c0_115 = arith.constant 0 : index
    %c384 = arith.constant 384 : index
    %227 = vector.load %arg4[%c0_115, %c384] : memref<72x768xf32, #tpu.memory_space<vmem>>, vector<64x64xf32>
    %cst_116 = arith.constant dense<0.000000e+00> : vector<16x64xf32>
    %228 = tpu.matmul %226, %227, %cst_116 {dimension_numbers = #tpu.dot_dimension_numbers<[1], [0], [0], [1], [0, 0, 1, 1], [], []>} : vector<16x64xf32>, vector<64x64xf32>, vector<16x64xf32> -> vector<16x64xf32>
    %c446 = arith.constant 446 : index
    %c0_117 = arith.constant 0 : index
    %229 = vector.load %arg3[%c446, %c0_117] : memref<448x64xf32, #tpu.memory_space<vmem>>, vector<1x64xf32>
    %230 = vector.broadcast %229 : vector<1x64xf32> to vector<16x64xf32>
    %231 = arith.addf %228, %230 : vector<16x64xf32>
    %232 = arith.addf %231, %198 : vector<16x64xf32>
    %c442 = arith.constant 442 : index
    %c0_118 = arith.constant 0 : index
    %233 = vector.load %arg3[%c442, %c0_118] : memref<448x64xf32, #tpu.memory_space<vmem>>, vector<1x64xf32>
    %c443 = arith.constant 443 : index
    %c0_119 = arith.constant 0 : index
    %234 = vector.load %arg3[%c443, %c0_119] : memref<448x64xf32, #tpu.memory_space<vmem>>, vector<1x64xf32>
    %cst_120 = arith.constant dense<0.000000e+00> : vector<16xf32>
    %235 = vector.multi_reduction <add>, %232, %cst_120 [1] : vector<16x64xf32> to vector<16xf32>
    %236 = vector.shape_cast %235 : vector<16xf32> to vector<16x1xf32>
    %cst_121 = arith.constant 6.400000e+01 : f32
    %237 = vector.broadcast %cst_121 : f32 to vector<16x1xf32>
    %238 = arith.divf %236, %237 : vector<16x1xf32>
    %239 = vector.broadcast %238 : vector<16x1xf32> to vector<16x64xf32>
    %240 = arith.subf %232, %239 : vector<16x64xf32>
    %241 = arith.mulf %240, %240 : vector<16x64xf32>
    %cst_122 = arith.constant dense<0.000000e+00> : vector<16xf32>
    %242 = vector.multi_reduction <add>, %241, %cst_122 [1] : vector<16x64xf32> to vector<16xf32>
    %243 = vector.shape_cast %242 : vector<16xf32> to vector<16x1xf32>
    %cst_123 = arith.constant 6.400000e+01 : f32
    %244 = vector.broadcast %cst_123 : f32 to vector<16x1xf32>
    %245 = arith.divf %243, %244 : vector<16x1xf32>
    %cst_124 = arith.constant 9.99999974E-6 : f32
    %246 = vector.broadcast %cst_124 : f32 to vector<16x1xf32>
    %247 = arith.addf %245, %246 : vector<16x1xf32>
    %248 = math.rsqrt %247 : vector<16x1xf32>
    %249 = vector.broadcast %248 : vector<16x1xf32> to vector<16x64xf32>
    %250 = arith.mulf %240, %249 : vector<16x64xf32>
    %251 = vector.broadcast %233 : vector<1x64xf32> to vector<16x64xf32>
    %252 = arith.mulf %250, %251 : vector<16x64xf32>
    %253 = vector.broadcast %234 : vector<1x64xf32> to vector<16x64xf32>
    %254 = arith.addf %252, %253 : vector<16x64xf32>
    %c0_125 = arith.constant 0 : index
    %c512 = arith.constant 512 : index
    %255 = vector.load %arg4[%c0_125, %c512] : memref<72x768xf32, #tpu.memory_space<vmem>>, vector<64x128xf32>
    %cst_126 = arith.constant dense<0.000000e+00> : vector<16x128xf32>
    %256 = tpu.matmul %254, %255, %cst_126 {dimension_numbers = #tpu.dot_dimension_numbers<[1], [0], [0], [1], [0, 0, 1, 1], [], []>} : vector<16x64xf32>, vector<64x128xf32>, vector<16x128xf32> -> vector<16x128xf32>
    %c64_127 = arith.constant 64 : index
    %c512_128 = arith.constant 512 : index
    %257 = vector.load %arg4[%c64_127, %c512_128] : memref<72x768xf32, #tpu.memory_space<vmem>>, vector<1x128xf32>
    %258 = vector.broadcast %257 : vector<1x128xf32> to vector<16x128xf32>
    %259 = arith.addf %256, %258 : vector<16x128xf32>
    %cst_129 = arith.constant 5.000000e-01 : f32
    %260 = vector.broadcast %cst_129 : f32 to vector<16x128xf32>
    %261 = arith.mulf %260, %259 : vector<16x128xf32>
    %cst_130 = arith.constant 0.707106769 : f32
    %262 = vector.broadcast %cst_130 : f32 to vector<16x128xf32>
    %263 = arith.mulf %259, %262 : vector<16x128xf32>
    %264 = math.erf %263 : vector<16x128xf32>
    %cst_131 = arith.constant 1.000000e+00 : f32
    %265 = vector.broadcast %cst_131 : f32 to vector<16x128xf32>
    %266 = arith.addf %265, %264 : vector<16x128xf32>
    %267 = arith.mulf %261, %266 : vector<16x128xf32>
    %c168 = arith.constant 168 : index
    %c0_132 = arith.constant 0 : index
    %268 = vector.load %arg3[%c168, %c0_132] : memref<448x64xf32, #tpu.memory_space<vmem>>, vector<128x64xf32>
    %cst_133 = arith.constant dense<0.000000e+00> : vector<16x64xf32>
    %269 = tpu.matmul %267, %268, %cst_133 {dimension_numbers = #tpu.dot_dimension_numbers<[1], [0], [0], [1], [0, 0, 1, 1], [], []>} : vector<16x128xf32>, vector<128x64xf32>, vector<16x64xf32> -> vector<16x64xf32>
    %c447 = arith.constant 447 : index
    %c0_134 = arith.constant 0 : index
    %270 = vector.load %arg3[%c447, %c0_134] : memref<448x64xf32, #tpu.memory_space<vmem>>, vector<1x64xf32>
    %271 = vector.broadcast %270 : vector<1x64xf32> to vector<16x64xf32>
    %272 = arith.addf %269, %271 : vector<16x64xf32>
    %273 = arith.addf %272, %254 : vector<16x64xf32>
    %c444 = arith.constant 444 : index
    %c0_135 = arith.constant 0 : index
    %274 = vector.load %arg3[%c444, %c0_135] : memref<448x64xf32, #tpu.memory_space<vmem>>, vector<1x64xf32>
    %c445 = arith.constant 445 : index
    %c0_136 = arith.constant 0 : index
    %275 = vector.load %arg3[%c445, %c0_136] : memref<448x64xf32, #tpu.memory_space<vmem>>, vector<1x64xf32>
    %cst_137 = arith.constant dense<0.000000e+00> : vector<16xf32>
    %276 = vector.multi_reduction <add>, %273, %cst_137 [1] : vector<16x64xf32> to vector<16xf32>
    %277 = vector.shape_cast %276 : vector<16xf32> to vector<16x1xf32>
    %cst_138 = arith.constant 6.400000e+01 : f32
    %278 = vector.broadcast %cst_138 : f32 to vector<16x1xf32>
    %279 = arith.divf %277, %278 : vector<16x1xf32>
    %280 = vector.broadcast %279 : vector<16x1xf32> to vector<16x64xf32>
    %281 = arith.subf %273, %280 : vector<16x64xf32>
    %282 = arith.mulf %281, %281 : vector<16x64xf32>
    %cst_139 = arith.constant dense<0.000000e+00> : vector<16xf32>
    %283 = vector.multi_reduction <add>, %282, %cst_139 [1] : vector<16x64xf32> to vector<16xf32>
    %284 = vector.shape_cast %283 : vector<16xf32> to vector<16x1xf32>
    %cst_140 = arith.constant 6.400000e+01 : f32
    %285 = vector.broadcast %cst_140 : f32 to vector<16x1xf32>
    %286 = arith.divf %284, %285 : vector<16x1xf32>
    %cst_141 = arith.constant 9.99999974E-6 : f32
    %287 = vector.broadcast %cst_141 : f32 to vector<16x1xf32>
    %288 = arith.addf %286, %287 : vector<16x1xf32>
    %289 = math.rsqrt %288 : vector<16x1xf32>
    %290 = vector.broadcast %289 : vector<16x1xf32> to vector<16x64xf32>
    %291 = arith.mulf %281, %290 : vector<16x64xf32>
    %292 = vector.broadcast %274 : vector<1x64xf32> to vector<16x64xf32>
    %293 = arith.mulf %291, %292 : vector<16x64xf32>
    %294 = vector.broadcast %275 : vector<1x64xf32> to vector<16x64xf32>
    %295 = arith.addf %293, %294 : vector<16x64xf32>
    %c0_142 = arith.constant 0 : index
    %c640 = arith.constant 640 : index
    %296 = vector.load %arg4[%c0_142, %c640] : memref<72x768xf32, #tpu.memory_space<vmem>>, vector<64x3xf32>
    %cst_143 = arith.constant dense<0.000000e+00> : vector<16x3xf32>
    %297 = tpu.matmul %295, %296, %cst_143 {dimension_numbers = #tpu.dot_dimension_numbers<[1], [0], [0], [1], [0, 0, 1, 1], [], []>} : vector<16x64xf32>, vector<64x3xf32>, vector<16x3xf32> -> vector<16x3xf32>
    %c64_144 = arith.constant 64 : index
    %c640_145 = arith.constant 640 : index
    %298 = vector.load %arg4[%c64_144, %c640_145] : memref<72x768xf32, #tpu.memory_space<vmem>>, vector<1x3xf32>
    %299 = vector.broadcast %298 : vector<1x3xf32> to vector<16x3xf32>
    %300 = arith.addf %297, %299 : vector<16x3xf32>
    %301 = vector.extract_strided_slice %300 {offsets = [0, 0], sizes = [1, 3], strides = [1, 1]} : vector<16x3xf32> to vector<1x3xf32>
    %302 = vector.extract_strided_slice %300 {offsets = [8, 0], sizes = [1, 3], strides = [1, 1]} : vector<16x3xf32> to vector<1x3xf32>
    %303 = tpu.concatenate %301, %302 in 0 : vector<1x3xf32>, vector<1x3xf32> -> vector<2x3xf32>
    %304 = vector.extract_strided_slice %303 {offsets = [0, 0], sizes = [2, 1], strides = [1, 1]} : vector<2x3xf32> to vector<2x1xf32>
    %c0_146 = arith.constant 0 : index
    %c0_147 = arith.constant 0 : index
    %c0_148 = arith.constant 0 : index
    %305 = vector.load %arg5[%c0_146, %c0_147, %c0_148] : memref<3x2x3xf32, #tpu.memory_space<vmem>>, vector<1x2x3xf32>
    %306 = vector.shape_cast %305 : vector<1x2x3xf32> to vector<2x3xf32>
    %307 = vector.broadcast %304 : vector<2x1xf32> to vector<2x3xf32>
    %308 = arith.mulf %307, %306 : vector<2x3xf32>
    %309 = vector.extract_strided_slice %303 {offsets = [0, 1], sizes = [2, 1], strides = [1, 1]} : vector<2x3xf32> to vector<2x1xf32>
    %c1_149 = arith.constant 1 : index
    %c0_150 = arith.constant 0 : index
    %c0_151 = arith.constant 0 : index
    %310 = vector.load %arg5[%c1_149, %c0_150, %c0_151] : memref<3x2x3xf32, #tpu.memory_space<vmem>>, vector<1x2x3xf32>
    %311 = vector.shape_cast %310 : vector<1x2x3xf32> to vector<2x3xf32>
    %312 = vector.broadcast %309 : vector<2x1xf32> to vector<2x3xf32>
    %313 = arith.mulf %312, %311 : vector<2x3xf32>
    %314 = arith.addf %308, %313 : vector<2x3xf32>
    %315 = vector.extract_strided_slice %303 {offsets = [0, 2], sizes = [2, 1], strides = [1, 1]} : vector<2x3xf32> to vector<2x1xf32>
    %c2_152 = arith.constant 2 : index
    %c0_153 = arith.constant 0 : index
    %c0_154 = arith.constant 0 : index
    %316 = vector.load %arg5[%c2_152, %c0_153, %c0_154] : memref<3x2x3xf32, #tpu.memory_space<vmem>>, vector<1x2x3xf32>
    %317 = vector.shape_cast %316 : vector<1x2x3xf32> to vector<2x3xf32>
    %318 = vector.broadcast %315 : vector<2x1xf32> to vector<2x3xf32>
    %319 = arith.mulf %318, %317 : vector<2x3xf32>
    %320 = arith.addf %314, %319 : vector<2x3xf32>
    %c0_155 = arith.constant 0 : index
    %c0_156 = arith.constant 0 : index
    %c0_157 = arith.constant 0 : index
    %321 = vector.load %arg6[%c0_155, %c0_156, %c0_157] : memref<1x2x3xf32, #tpu.memory_space<vmem>>, vector<1x2x3xf32>
    %322 = vector.shape_cast %321 : vector<1x2x3xf32> to vector<2x3xf32>
    %323 = vector.shape_cast %320 : vector<2x3xf32> to vector<1x2x3xf32>
    tpu.vector_store %arg6[%c0_155, %c0_156, %c0_157], %323 {strides = array<i32>} : memref<1x2x3xf32, #tpu.memory_space<vmem>>, vector<1x2x3xf32>,
    return
  }
  func.func @transform_0(%arg0: i32, %arg1: memref<8x16xi32, #tpu.memory_space<smem>>, %arg2: memref<8x16xi32, #tpu.memory_space<smem>>) -> (i32, i32) {
    %c0_i32 = arith.constant 0 : i32
    %c0_i32_0 = arith.constant 0 : i32
    %c0_i32_1 = arith.constant 0 : i32
    return %c0_i32, %c0_i32_0 : i32, i32
  }
  func.func @transform_1(%arg0: i32, %arg1: memref<8x16xi32, #tpu.memory_space<smem>>, %arg2: memref<8x16xi32, #tpu.memory_space<smem>>) -> (i32, i32) {
    %c0_i32 = arith.constant 0 : i32
    %c0_i32_0 = arith.constant 0 : i32
    %c0_i32_1 = arith.constant 0 : i32
    return %c0_i32, %c0_i32_0 : i32, i32
  }
  func.func @transform_2(%arg0: i32, %arg1: memref<8x16xi32, #tpu.memory_space<smem>>, %arg2: memref<8x16xi32, #tpu.memory_space<smem>>) -> (i32, i32, i32) {
    %c0_i32 = arith.constant 0 : i32
    %c0_i32_0 = arith.constant 0 : i32
    %c0_i32_1 = arith.constant 0 : i32
    return %arg0, %c0_i32, %c0_i32_0 : i32, i32, i32
  }
  func.func @transform_3(%arg0: i32, %arg1: memref<8x16xi32, #tpu.memory_space<smem>>, %arg2: memref<8x16xi32, #tpu.memory_space<smem>>) -> (i32, i32, i32) {
    %c0_i32 = arith.constant 0 : i32
    %c0_i32_0 = arith.constant 0 : i32
    %c0_i32_1 = arith.constant 0 : i32
    return %arg0, %c0_i32, %c0_i32_0 : i32, i32, i32
  }
}

</mosaic_0001>

<bundles_post_ra>
// kernel: ensembler_forward.1
= control target key start
LH: loop header
LB: loop body
LE: loop exit
PB: predicated region body
PF: predicated region fallthrough
CT: control target
= control target key end

     0   :  { %s1306_s24 = smov [#allocation4]   ;;  %s1307_s25 = smov [#allocation5]   ;;  %s1890_s0 = inlined_call_operand.vmem [shape: s32[8,16], index: 0, kind: input, shape index: {}]   ;;  %s1891_s2 = inlined_call_operand.vmem [shape: f32[448,64], index: 2, kind: input, shape index: {}]   ;;  %s1892_s3 = inlined_call_operand.vmem [shape: f32[72,768], index: 3, kind: input, shape index: {}]   ;;  %s1893_s4 = inlined_call_operand.vmem [shape: f32[24,2,3], index: 4, kind: input, shape index: {}]   ;;  %s1894_s5 = inlined_call_operand.vmem [shape: f32[8,2,3], index: 5, kind: output, shape index: {}]   ;;  %s1895_s1 = inlined_call_operand.vmem [shape: s32[8,16], index: 1, kind: input, shape index: {}]  }
   0x1   :  { %s11_s20 = sshll.u32 %s1890_s0, 4  ;;  %s16_s23 = sshll.u32 %s1895_s1, 4  ;;  %s12_s20 = int_to_ptr.vmem [resolvable:$true] %s11_s20  ;;  %s17_s23 = int_to_ptr.vmem [resolvable:$true] %s16_s23 }
   0x2   :  { %14 = dma.vmem_to_smem %s12_s20, 128, %s1306_s24, [#allocation3] }
   0x3   :  { %19 = dma.vmem_to_smem %s17_s23, 128, %s1307_s25, [#allocation3] }
   0x4   :  { %1300 = dma.done.wait [#allocation3], 256 }
   0x5   :  { %1301 = vsyncadd [#allocation3], 4294967040 }
   0x6   :  { %22 = sfence }
   0x7   :  { %s1348_s26 = smov 0  }
   0x8 LB: > { %s1354_s0 = sadd.s32 4294967295, %s1304_s26   ;;  %p1167_p0 = scmp.ge.s32.totalorder %s1304_s26, 1  ;;  %s1304_s26 = sphi %s1348_s26, %s28_s26  }
   0x9   : > { %p153_p1 = scmp.lt.s32.totalorder %s1304_s26, 9 }
   0xb   : > { %p154_p2 = pnand %p1167_p0, %p153_p1 }
   0xc   : > { %s1359_s1 = sshll.u32 (!%p154_p2), %s1354_s0, 7  ;;  %p182_p4 = scmp.lt.s32.totalorder (!%p154_p2), %s1354_s0, 7 }
   0xd   : > { %157 = sbr.rel (%p154_p2) target bundleno = 2276 (0x8e4), region = 32  ;;  %s187_s27 = sld [smem:[#allocation4 + %s1359_s1]] (!%p154_p2) }
   0xe   : > { %s197_s28 = sadd.s32 (!%p154_p2), 1, %s1359_s1  ;;  %s188_s29 = sld [smem:[#allocation5 + %s1359_s1]] (!%p154_p2) }
   0xf   : > { %s207_s30 = sadd.s32 (!%p154_p2), 2, %s1359_s1  ;;  %s198_s6 = sld [smem:[#allocation4 + %s197_s28]] (!%p154_p2) }
  0x10   : > { %s217_s7 = sadd.s32 (!%p154_p2), 3, %s1359_s1  ;;  %s199_s8 = sld [smem:[#allocation5 + %s197_s28]] (!%p154_p2) }
  0x11   : > { %s227_s9 = sadd.s32 (!%p154_p2), 4, %s1359_s1  ;;  %s208_s10 = sld [smem:[#allocation4 + %s207_s30]] (!%p154_p2) }
  0x12   : > { %s237_s11 = sadd.s32 5, %s1359_s1  ;;  %s209_s12 = sld [smem:[#allocation5 + %s207_s30]]  ;;  %vm195_vm0 = vcmask 516096   ;;  %vm351_vm1 = vcmask 523264   ;;  %v1308_v52 = vmov 64.0  }
  0x13   : > { %s247_s13 = sadd.s32 6, %s1359_s1  ;;  %s189_s16 = scalar_lea.vmem %s1891_s2, %s187_s27  ;;  %1246 = vrcp.f32 %v1308_v52 }
  0x14   : > { %s218_s17 = sld [smem:[#allocation4 + %s217_s7]]  ;;  %v190_v0 = vld [vmem:[%s189_s16] sm:$0x1]  ;;  %s1092_s20 = scalar_lea.vmem %s1891_s2, %s188_s29 }
  0x15   : > { %s219_s21 = sld [smem:[#allocation5 + %s217_s7]]  ;;  %v1171_v1 = vld [vmem:[%s1092_s20 + $0x68] sm:$0x1]  ;;  %s200_s24 = scalar_lea.vmem %s1891_s2, %s198_s6 }
  0x16   : > { %s228_s25 = sld [smem:[#allocation4 + %s227_s9]]  ;;  %v194_v2 = vadd.f32 %v1171_v1, %v190_v0  ;;  %v201_v3 = vld [vmem:[%s200_s24] sm:$0x1]  ;;  %s1095_s27 = scalar_lea.vmem %s1891_s2, %s199_s8 }
  0x17   : > { %s229_s14 = sld [smem:[#allocation5 + %s227_s9]]  ;;  %v1172_v4 = vld [vmem:[%s1095_s27 + $0x68] sm:$0x1]  ;;  %s210_s7 = scalar_lea.vmem %s1891_s2, %s208_s10 }
  0x18   : > { %s238_s16 = sld [smem:[#allocation4 + %s237_s11]]  ;;  %196 = vst.msk [vmem:[#allocation2] sm:$0x1] %vm195_vm0, %v194_v2  ;;  %v205_v5 = vadd.f32 %v1172_v4, %v201_v3  ;;  %v211_v6 = vld [vmem:[%s210_s7] sm:$0x1]  ;;  %s1098_s19 = scalar_lea.vmem %s1891_s2, %s209_s12 }
  0x19   : > { %s239_s20 = sld [smem:[#allocation5 + %s237_s11]]  ;;  %v1173_v7 = vld [vmem:[%s1098_s19 + $0x68] sm:$0x1]  ;;  %s257_s15 = sadd.s32 7, %s1359_s1  ;;  %v1247_v53 = vpop.eup %1246 }
  0x1a   : > { %s220_s22 = scalar_lea.vmem %s1891_s2, %s218_s17  ;;  %s248_s23 = sld [smem:[#allocation4 + %s247_s13]]  ;;  %206 = vst.msk [vmem:[#allocation2 + $0x1] sm:$0x1] %vm195_vm0, %v205_v5  ;;  %v215_v8 = vadd.f32 %v1173_v7, %v211_v6  ;;  %v359_v54 = vmul.f32 64.0, %v1247_v53  ;;  %vm363_vm2 = vweird.f32 %v1247_v53  ;;  %v430_v5 = vld [vmem:[%s1892_s3 + $0x150] sm:$0xff]  ;;  %v431_v6 = vld [vmem:[%s1892_s3 + $0x158] sm:$0xff] }
  0x1b   : > { %v221_v9 = vld [vmem:[%s220_s22] sm:$0x1]  ;;  %s1101_s28 = scalar_lea.vmem %s1891_s2, %s219_s21  ;;  %s249_s30 = sld [smem:[#allocation5 + %s247_s13]]  ;;  %456 = vmatpush.msra.mxu0 %v430_v5  ;;  %479 = vmatpush.msra.mxu3 %v431_v6 }
  0x1c   : > { %v1174_v10 = vld [vmem:[%s1101_s28 + $0x68] sm:$0x1]  ;;  %s230_s27 = scalar_lea.vmem %s1891_s2, %s228_s25  ;;  %216 = vst.msk [vmem:[#allocation2 + $0x2] sm:$0x1] %vm195_vm0, %v215_v8  ;;  %s258_s6 = sld [smem:[#allocation4 + %s257_s15]]  ;;  %v360_v55 = vsub.f32 1.0, %v359_v54 }
  0x1d   : > { %v225_v11 = vadd.f32 %v1174_v10, %v221_v9  ;;  %v231_v12 = vld [vmem:[%s230_s27] sm:$0x1]  ;;  %s1104_s7 = scalar_lea.vmem %s1891_s2, %s229_s14  ;;  %s259_s19 = sld [smem:[#allocation5 + %s257_s15]]  ;;  %v428_v9 = vld [vmem:[%s1892_s3 + $0x128] sm:$0xff]  ;;  %v429_v10 = vld [vmem:[%s1892_s3 + $0x130] sm:$0xff] }
  0x1e   : > { %v1175_v13 = vld [vmem:[%s1104_s7 + $0x68] sm:$0x1]  ;;  %s240_s13 = scalar_lea.vmem %s1891_s2, %s238_s16  ;;  %s267_s22 = sadd.s32 8, %s1359_s1  ;;  %v361_v56 = vmul.f32 %v1247_v53, %v360_v55  ;;  %v432_v7 = vld [vmem:[%s1892_s3 + $0x160] sm:$0xff]  ;;  %480 = vmatpush.msra.mxu3 %v428_v9  ;;  %v522_v9 = vld [vmem:[%s1891_s2 + $0x150] sm:$0xff] }
  0x1f   : > { %226 = vst.msk [vmem:[#allocation2 + $0x3] sm:$0x1] %vm195_vm0, %v225_v11  ;;  %v235_v14 = vadd.f32 %v1175_v13, %v231_v12  ;;  %v241_v15 = vld [vmem:[%s240_s13] sm:$0x1]  ;;  %s1107_s9 = scalar_lea.vmem %s1891_s2, %s239_s20  ;;  %s268_s28 = sld [smem:[#allocation4 + %s267_s22]]  ;;  %502 = vmatpush.msra.mxu2 %v432_v7  ;;  %v424_v11 = vld [vmem:[%s1892_s3 + $0xf0] sm:$0xff] }
  0x20   : > { %v1176_v16 = vld [vmem:[%s1107_s9 + $0x68] sm:$0x1]  ;;  %s250_s24 = scalar_lea.vmem %s1891_s2, %s248_s23  ;;  %s269_s27 = sld [smem:[#allocation5 + %s267_s22]]  ;;  %v362_v57 = vadd.f32 %v1247_v53, %v361_v56  ;;  %v427_v8 = vld [vmem:[%s1892_s3 + $0x120] sm:$0xff]  ;;  %v425_v12 = vld [vmem:[%s1892_s3 + $0xf8] sm:$0xff] }
  0x21   : > { %236 = vst.msk [vmem:[#allocation2 + $0x4] sm:$0x1] %vm195_vm0, %v235_v14  ;;  %v245_v17 = vadd.f32 %v1176_v16, %v241_v15  ;;  %v251_v18 = vld [vmem:[%s250_s24] sm:$0x1]  ;;  %s1110_s12 = scalar_lea.vmem %s1891_s2, %s249_s30  ;;  %s277_s15 = sadd.s32 9, %s1359_s1  ;;  %457 = vmatpush.msra.mxu0 %v427_v8  ;;  %503 = vmatpush.msra.mxu2 %v429_v10  ;;  %v422_v16 = vld [vmem:[%s1892_s3 + $0xc8] sm:$0xff] }
  0x22   : > { %v1177_v19 = vld [vmem:[%s1110_s12 + $0x68] sm:$0x1]  ;;  %s287_s20 = sadd.s32 10, %s1359_s1  ;;  %s260_s23 = scalar_lea.vmem %s1891_s2, %s258_s6  ;;  %v1499_v58 = vsel %vm363_vm2, %v1247_v53, %v362_v57  ;;  %v426_v13 = vld [vmem:[%s1892_s3 + $0x100] sm:$0xff]  ;;  %481 = vmatpush.msra.mxu3 %v425_v12  ;;  %v523_v7 = vld [vmem:[%s1891_s2 + $0x158] sm:$0xff] }
  0x23   : > { %246 = vst.msk [vmem:[#allocation2 + $0x5] sm:$0x1] %vm195_vm0, %v245_v17  ;;  %v255_v20 = vadd.f32 %v1177_v19, %v251_v18  ;;  %s278_s7 = sld [smem:[#allocation4 + %s277_s15]]  ;;  %v261_v21 = vld [vmem:[%s260_s23] sm:$0x1]  ;;  %s1113_s13 = scalar_lea.vmem %s1891_s2, %s259_s19  ;;  %458 = vmatpush.msra.mxu0 %v424_v11  ;;  %504 = vmatpush.msra.mxu2 %v426_v13  ;;  %v423_v17 = vld [vmem:[%s1892_s3 + $0xd0] sm:$0xff] }
  0x24   : > { %s279_s25 = sld [smem:[#allocation5 + %s277_s15]]  ;;  %v1178_v22 = vld [vmem:[%s1113_s13 + $0x68] sm:$0x1]  ;;  %s297_s8 = sadd.s32 11, %s1359_s1  ;;  %v421_v15 = vld [vmem:[%s1892_s3 + $0xc0] sm:$0xff]  ;;  %482 = vmatpush.msra.mxu3 %v422_v16  ;;  %v418_v19 = vld [vmem:[%s1892_s3 + $0x90] sm:$0xff] }
  0x25   : > { %256 = vst.msk [vmem:[#allocation2 + $0x6] sm:$0x1] %vm195_vm0, %v255_v20  ;;  %s288_s30 = sld [smem:[#allocation4 + %s287_s20]]  ;;  %v265_v23 = vadd.f32 %v1178_v22, %v261_v21  ;;  %s270_s14 = scalar_lea.vmem %s1891_s2, %s268_s28  ;;  %459 = vmatpush.msra.mxu0 %v421_v15  ;;  %505 = vmatpush.msra.mxu2 %v423_v17  ;;  %v419_v20 = vld [vmem:[%s1892_s3 + $0x98] sm:$0xff]  ;;  %v420_v21 = vld [vmem:[%s1892_s3 + $0xa0] sm:$0xff]  ;;  %v521_v12 = vld [vmem:[%s1891_s2 + $0x148] sm:$0xff] }
  0x26   : > { %s289_s10 = sld [smem:[#allocation5 + %s287_s20]]  ;;  %v271_v24 = vld [vmem:[%s270_s14] sm:$0x1]  ;;  %s1116_s16 = scalar_lea.vmem %s1891_s2, %s269_s27  ;;  %483 = vmatpush.msra.mxu3 %v419_v20  ;;  %v519_v17 = vld [vmem:[%s1891_s2 + $0x138] sm:$0xff] }
  0x27   : > { %s298_s11 = sld [smem:[#allocation4 + %s297_s8]]  ;;  %266 = vst.msk [vmem:[#allocation2 + $0x7] sm:$0x1] %vm195_vm0, %v265_v23  ;;  %v1179_v25 = vld [vmem:[%s1116_s16 + $0x68] sm:$0x1]  ;;  %s307_s12 = sadd.s32 12, %s1359_s1  ;;  %460 = vmatpush.msra.mxu0 %v418_v19  ;;  %506 = vmatpush.msra.mxu2 %v420_v21 }
  0x28   : > { %s299_s19 = sld [smem:[#allocation5 + %s297_s8]]  ;;  %v275_v26 = vadd.f32 %v1179_v25, %v271_v24  ;;  %s317_s9 = sadd.s32 13, %s1359_s1  ;;  %v415_v23 = vld [vmem:[%s1892_s3 + $0x60] sm:$0xff]  ;;  %v416_v24 = vld [vmem:[%s1892_s3 + $0x68] sm:$0xff]  ;;  %v417_v25 = vld [vmem:[%s1892_s3 + $0x70] sm:$0xff] }
  0x29   : > { %s280_s29 = scalar_lea.vmem %s1891_s2, %s278_s7  ;;  %s308_s23 = sld [smem:[#allocation4 + %s307_s12]]  ;;  %461 = vmatpush.msra.mxu0 %v415_v23  ;;  %484 = vmatpush.msra.mxu3 %v416_v24  ;;  %v518_v19 = vld [vmem:[%s1891_s2 + $0x130] sm:$0xff] }
  0x2a   : > { %v281_v27 = vld [vmem:[%s280_s29] sm:$0x1]  ;;  %s1119_s21 = scalar_lea.vmem %s1891_s2, %s279_s25  ;;  %s1447_s18 = sld [smem:[#allocation5 + %s307_s12]]  ;;  %276 = vst.msk [vmem:[#allocation2 + $0x8] sm:$0x1] %vm195_vm0, %v275_v26  ;;  %507 = vmatpush.msra.mxu2 %v417_v25  ;;  %v412_v26 = vld [vmem:[%s1892_s3 + $0x30] sm:$0xff] }
  0x2b   : > { %v1180_v28 = vld [vmem:[%s1119_s21 + $0x68] sm:$0x1]  ;;  %s290_s8 = scalar_lea.vmem %s1891_s2, %s288_s30  ;;  %s318_s6 = sld [smem:[#allocation4 + %s317_s9]]  ;;  %462 = vmatpush.msra.mxu0 %v412_v26 }
  0x2c   : > { %v285_v29 = vadd.f32 %v1180_v28, %v281_v27  ;;  %v291_v30 = vld [vmem:[%s290_s8] sm:$0x1]  ;;  %s1122_s14 = scalar_lea.vmem %s1891_s2, %s289_s10  ;;  %s319_s12 = sld [smem:[#allocation5 + %s317_s9]]  ;;  %v413_v27 = vld [vmem:[%s1892_s3 + $0x38] sm:$0xff] }
  0x2d   : > { %v1181_v31 = vld [vmem:[%s1122_s14 + $0x68] sm:$0x1]  ;;  %s300_s16 = scalar_lea.vmem %s1891_s2, %s298_s11  ;;  %s327_s29 = sadd.s32 14, %s1359_s1  ;;  %v414_v28 = vld [vmem:[%s1892_s3 + $0x40] sm:$0xff]  ;;  %485 = vmatpush.msra.mxu3 %v413_v27 }
  0x2e   : > { %286 = vst.msk [vmem:[#allocation2 + $0x9] sm:$0x1] %vm195_vm0, %v285_v29  ;;  %v295_v32 = vadd.f32 %v1181_v31, %v291_v30  ;;  %v301_v33 = vld [vmem:[%s300_s16] sm:$0x1]  ;;  %s1125_s17 = scalar_lea.vmem %s1891_s2, %s299_s19  ;;  %s328_s21 = sld [smem:[#allocation4 + %s327_s29]]  ;;  %508 = vmatpush.msra.mxu2 %v414_v28  ;;  %v410_v30 = vld [vmem:[%s1892_s3 + $0x8] sm:$0xff] }
  0x2f   : > { %v347_v34 = vld [vmem:[#allocation2] sm:$0xff]  ;;  %v1182_v35 = vld [vmem:[%s1125_s17 + $0x68] sm:$0x1]  ;;  %s310_s20 = scalar_lea.vmem %s1891_s2, %s308_s23  ;;  %s329_s8 = sld [smem:[#allocation5 + %s327_s29]]  ;;  %v411_v31 = vld [vmem:[%s1892_s3 + $0x10] sm:$0xff]  ;;  %486 = vmatpush.msra.mxu3 %v410_v30 }
  0x30   : > { %v352_v36 = vsel %vm351_vm1, %v347_v34, 0.0  ;;  %296 = vst.msk [vmem:[#allocation2 + $0xa] sm:$0x1] %vm195_vm0, %v295_v32  ;;  %v305_v37 = vadd.f32 %v1182_v35, %v301_v33  ;;  %v311_v38 = vld [vmem:[%s310_s20] sm:$0x1]  ;;  %s1128_s13 = scalar_lea.vmem %s1891_s2, %s1447_s18  ;;  %s337_s19 = sadd.s32 15, %s1359_s1  ;;  %509 = vmatpush.msra.mxu2 %v411_v31 }
  0x31   : > { %353 = vadd.xlane.f32.xlu0 %v352_v36  ;;  %v1183_v39 = vld [vmem:[%s1128_s13 + $0x68] sm:$0x1]  ;;  %s320_s7 = scalar_lea.vmem %s1891_s2, %s318_s6  ;;  %s338_s22 = sld [smem:[#allocation4 + %s337_s19]]  ;;  %v409_v29 = vld [vmem:[%s1892_s3] sm:$0xff] }
  0x32   : > { %306 = vst.msk [vmem:[#allocation2 + $0xb] sm:$0x1] %vm195_vm0, %v305_v37  ;;  %v315_v40 = vadd.f32 %v1183_v39, %v311_v38  ;;  %v321_v41 = vld [vmem:[%s320_s7] sm:$0x1]  ;;  %s1131_s24 = scalar_lea.vmem %s1891_s2, %s319_s12  ;;  %s339_s16 = sld [smem:[#allocation5 + %s337_s19]]  ;;  %463 = vmatpush.msra.mxu0 %v409_v29 }
  0x33   : > { %v1184_v42 = vld [vmem:[%s1131_s24 + $0x68] sm:$0x1]  ;;  %v1238_v39 = vld [vmem:[%s1891_s2 + $0x1b8] ss:$0 sm:$0xff]  ;;  %s176_s24 = smul.u32 3, %s1354_s0  ;;  %s1899_s0 = smov (!%p182_p4, %s1354_s0), 7 }
  0x34   : > { %316 = vst.msk [vmem:[#allocation2 + $0xc] sm:$0x1] %vm195_vm0, %v315_v40  ;;  %v325_v43 = vadd.f32 %v1184_v42, %v321_v41  ;;  %s330_s30 = scalar_lea.vmem %s1891_s2, %s328_s21  ;;  %s1169_s15 = sshll.u32 %s1899_s0, 1 }
  0x35   : > { %v331_v44 = vld [vmem:[%s330_s30] sm:$0x1]  ;;  %s1134_s6 = scalar_lea.vmem %s1891_s2, %s329_s8  ;;  %p177_p3 = scmp.lt.s32.totalorder %s176_s24, 23 }
  0x36   : > { %326 = vst.msk [vmem:[#allocation2 + $0xd] sm:$0x1] %vm195_vm0, %v325_v43  ;;  %v1185_v45 = vld [vmem:[%s1134_s6 + $0x68] sm:$0x1]  ;;  %v1239_v43 = vld [vmem:[%s1891_s2 + $0x1b9] ss:$0 sm:$0xff]  ;;  %s185_s29 = scalar_lea.vmem %s1894_s5, %s1169_s15 }
  0x37   : > { %v335_v46 = vadd.f32 %v1185_v45, %v331_v44  ;;  %s340_s10 = scalar_lea.vmem %s1891_s2, %s338_s22  ;;  %s1897_s24 = smov (!%p177_p3, %s176_s24), 23 }
  0x38   : > { %v341_v47 = vld [vmem:[%s340_s10] sm:$0x1]  ;;  %s1137_s11 = scalar_lea.vmem %s1891_s2, %s339_s16  ;;  %s1168_s16 = sshll.u32 %s1897_s24, 1 }
  0x39   : > { %336 = vst.msk [vmem:[#allocation2 + $0xe] sm:$0x1] %vm195_vm0, %v335_v46  ;;  %v1186_v48 = vld [vmem:[%s1137_s11 + $0x68] sm:$0x1]  ;;  %s180_s30 = scalar_lea.vmem %s1893_s4, %s1168_s16 }
  0x3a   : > { %v345_v49 = vadd.f32 %v1186_v48, %v341_v47 }
  0x3c   : > { %346 = vst.msk [vmem:[#allocation2 + $0xf] sm:$0x1] %vm195_vm0, %v345_v49 }
  0x43   : > { %v348_v50 = vld [vmem:[#allocation2 + $0x8] sm:$0xff] }
  0x44   : > { %v355_v51 = vsel %vm351_vm1, %v348_v50, 0.0 }
  0x45   : > { %356 = vadd.xlane.f32.xlu0 %v355_v51 }
  0xa4   : > { %v354_v59 = vpop.xlane.xlu0 %353 }
  0xa5   : > { %v365_v60 = vmul.f32 %v1499_v58, %v354_v59 }
  0xa7   : > { %v1502_v61 = vsub.f32 %v347_v34, %v365_v60  ;;  %v1187_v60 = vld [vmem:[%s1892_s3 + $0x180] ss:$8 sm:$0x7] }
  0xa8   : > { %v436_v29 = vperm.slane %v1187_v60, 0 }
  0xa9   : > { %v369_v62 = vmul.f32 %v1502_v61, %v1502_v61 }
  0xab   : > { %v371_v63 = vsel %vm351_vm1, %v369_v62, 0.0  ;;  %v437_v62 = vperm.slane %v1187_v60, 1 }
  0xac   : > { %372 = vadd.xlane.f32.xlu1 %v371_v63 }
  0xb8   : > { %v357_v0 = vpop.xlane.xlu0 %356 }
  0xb9   : > { %v366_v1 = vmul.f32 %v1499_v58, %v357_v0  ;;  %v524_v0 = vld [vmem:[%s1891_s2 + $0x160] sm:$0xff] }
  0xbb   : > { %v1508_v2 = vsub.f32 %v348_v50, %v366_v1 }
  0xbd   : > { %v370_v3 = vmul.f32 %v1508_v2, %v1508_v2 }
  0xbf   : > { %v374_v4 = vsel %vm351_vm1, %v370_v3, 0.0 }
  0xc0   : > { %375 = vadd.xlane.f32.xlu1 %v374_v4 }
 0x11f   : > { %v373_v14 = vpop.xlane.xlu1 %372 }
 0x120   : > { %v377_v18 = vmul.f32 %v373_v14, %v1499_v58  ;;  %v520_v14 = vld [vmem:[%s1891_s2 + $0x140] sm:$0xff] }
 0x122   : > { %v379_v22 = vadd.f32 1e-05, %v377_v18 }
 0x124   : > { %1248 = vrsqrt.f32 %v379_v22  ;;  %vm387_vm4 = vweird.f32 %v379_v22 }
 0x12a   : > { %v1249_v32 = vpop.eup %1248 }
 0x12b   : > { %v382_v33 = vmul.f32 %v1249_v32, %v379_v22  ;;  %vm388_vm3 = vweird.f32 %v1249_v32  ;;  %v517_v22 = vld [vmem:[%s1891_s2 + $0x128] sm:$0xff] }
 0x12c   : > { %vm389_vm5 = vmor %vm387_vm4, %vm388_vm3 }
 0x12d   : > { %v383_v34 = vmul.f32 %v1249_v32, %v382_v33 }
 0x12f   : > { %v384_v35 = vmul.f32 0.5, %v383_v34  ;;  %v615_v34 = vld [vmem:[%s1891_s2 + $0x1a0] sm:$0xff] }
 0x130   : > { %630 = vmatpush.msrb.mxu0 %v615_v34  ;;  %v778_v34 = vld [vmem:[%s1892_s3 + $0x110] sm:$0xff] }
 0x131   : > { %v385_v36 = vsub.f32 1.5, %v384_v35  ;;  %v614_v35 = vld [vmem:[%s1891_s2 + $0x198] sm:$0xff] }
 0x132   : > { %631 = vmatpush.msrb.mxu0 %v614_v35  ;;  %v777_v35 = vld [vmem:[%s1892_s3 + $0xe0] sm:$0xff] }
 0x133   : > { %v386_v37 = vmul.f32 %v1249_v32, %v385_v36  ;;  %v376_v38 = vpop.xlane.xlu1 %375  ;;  %v613_v36 = vld [vmem:[%s1891_s2 + $0x190] sm:$0xff] }
 0x134   : > { %v378_v41 = vmul.f32 %v376_v38, %v1499_v58  ;;  %632 = vmatpush.msrb.mxu0 %v613_v36  ;;  %v776_v36 = vld [vmem:[%s1892_s3 + $0xb0] sm:$0xff] }
 0x135   : > { %v390_v40 = vsel %vm389_vm5, %v1249_v32, %v386_v37  ;;  %v541_v37 = vld [vmem:[%s1891_s2 + $0x1a8] sm:$0xff] }
 0x136   : > { %v401_v42 = vmul.f32 %v390_v40, %v1502_v61  ;;  %v380_v44 = vadd.f32 1e-05, %v378_v41  ;;  %v438_v61 = vperm.slane %v1187_v60, 2  ;;  %v542_v41 = vld [vmem:[%s1891_s2 + $0x1b0] sm:$0xff] }
 0x138   : > { %v404_v45 = vmul.f32 %v1238_v39, %v401_v42  ;;  %1250 = vrsqrt.f32 %v380_v44  ;;  %vm397_vm7 = vweird.f32 %v380_v44 }
 0x13a   : > { %v1594_v46 = vadd.f32 %v1239_v43, %v404_v45  ;;  %v612_v45 = vld [vmem:[%s1891_s2 + $0x188] sm:$0xff] }
 0x13b   : > { %633 = vmatpush.msrb.mxu0 %v612_v45 }
 0x13c   : > { %1188 = vmatmul.msk.f32.vlgmr.msra.gmra.mxu0 %vm351_vm1, %v1594_v46  ;;  %1190 = vmatmul.msk.f32.vlgmr.msra.gmra.mxu3 %vm351_vm1, %v1594_v46 }
 0x13d   : > { %1192 = vmatmul.msk.f32.vlgmr.msra.gmra.mxu2 %vm351_vm1, %v1594_v46 }
 0x13e   : > { %v1251_v47 = vpop.eup %1250 }
 0x13f   : > { %v392_v48 = vmul.f32 %v1251_v47, %v380_v44  ;;  %vm398_vm6 = vweird.f32 %v1251_v47 }
 0x140   : > { %vm399_vm8 = vmor %vm397_vm7, %vm398_vm6 }
 0x141   : > { %v393_v49 = vmul.f32 %v1251_v47, %v392_v48  ;;  %v610_v48 = vld [vmem:[%s1891_s2 + $0x178] sm:$0xff] }
 0x143   : > { %v394_v50 = vmul.f32 0.5, %v393_v49  ;;  %v609_v49 = vld [vmem:[%s1891_s2 + $0x170] sm:$0xff] }
 0x145   : > { %v395_v51 = vsub.f32 1.5, %v394_v50  ;;  %v608_v50 = vld [vmem:[%s1891_s2 + $0x168] sm:$0xff] }
 0x147   : > { %v396_v52 = vmul.f32 %v1251_v47, %v395_v51 }
 0x149   : > { %v400_v53 = vsel %vm399_vm8, %v1251_v47, %v396_v52  ;;  %v611_v47 = vld [vmem:[%s1891_s2 + $0x180] sm:$0xff] }
 0x14a   : > { %v402_v54 = vmul.f32 %v400_v53, %v1508_v2  ;;  %634 = vmatpush.msrb.mxu0 %v611_v47 }
 0x14c   : > { %v405_v55 = vmul.f32 %v1238_v39, %v402_v54  ;;  %635 = vmatpush.msrb.mxu0 %v610_v48 }
 0x14e   : > { %v1603_v56 = vadd.f32 %v1239_v43, %v405_v55  ;;  %636 = vmatpush.msrb.mxu0 %v609_v49 }
 0x150   : > { %1189 = vmatmul.msk.f32.gmra.mxu0 %vm351_vm1, %v1603_v56  ;;  %1191 = vmatmul.msk.f32.gmra.mxu3 %vm351_vm1, %v1603_v56 }
 0x151   : > { %1193 = vmatmul.msk.f32.gmra.mxu2 %vm351_vm1, %v1603_v56  ;;  %637 = vmatpush.msrb.mxu0 %v608_v50 }
 0x1b9   : > { %v465_v28 = vpop.f32.mrf.mxu0 }
 0x1ba   : > { %v466_v31 = vadd.f32 %v465_v28, %v436_v29 }
 0x1bf   : > { %v488_v57 = vpop.f32.mrf.mxu3 }
 0x1c0   : > { %v511_v59 = vpop.f32.mrf.mxu2  ;;  %v489_v5 = vadd.f32 %v488_v57, %v437_v62 }
 0x1c1   : > { %v512_v3 = vadd.f32 %v511_v59, %v438_v61 }
 0x1c2   : > { %v531_v11 = vmul.f32 %v523_v7, %v489_v5  ;;  %v529_v21 = vmul.f32 %v521_v12, %v489_v5  ;;  %v527_v26 = vmul.f32 %v519_v17, %v489_v5  ;;  %v525_v30 = vmul.f32 %v517_v22, %v489_v5  ;;  %v680_v5 = vld [vmem:[%s1892_s3 + $0x18] sm:$0xff] }
 0x1c3   : > { %v539_v10 = vmul.f32 %v523_v7, %v512_v3  ;;  %v537_v15 = vmul.f32 %v521_v12, %v512_v3  ;;  %v535_v20 = vmul.f32 %v519_v17, %v512_v3  ;;  %v533_v24 = vmul.f32 %v517_v22, %v512_v3  ;;  %v681_v3 = vld [vmem:[%s1892_s3 + $0x48] sm:$0xff] }
 0x1cd   : > { %v468_v32 = vpop.f32.mrf.mxu0 }
 0x1ce   : > { %v469_v33 = vadd.f32 %v468_v32, %v436_v29 }
 0x1d3   : > { %v491_v63 = vpop.f32.mrf.mxu3 }
 0x1d4   : > { %v492_v1 = vadd.f32 %v491_v63, %v437_v62  ;;  %v514_v2 = vpop.f32.mrf.mxu2  ;;  %v686_v62 = vld [vmem:[%s1892_s3 + $0x138] sm:$0xff]  ;;  %v685_v63 = vld [vmem:[%s1892_s3 + $0x108] sm:$0xff] }
 0x1d5   : > { %v515_v4 = vadd.f32 %v514_v2, %v438_v61  ;;  %v687_v61 = vld [vmem:[%s1892_s3 + $0x168] sm:$0xff]  ;;  %v682_v2 = vld [vmem:[%s1892_s3 + $0x78] sm:$0xff] }
 0x1d6   : > { %v532_v6 = vmul.f32 %v524_v0, %v492_v1  ;;  %v530_v16 = vmul.f32 %v522_v9, %v492_v1  ;;  %v528_v25 = vmul.f32 %v520_v14, %v492_v1  ;;  %v526_v27 = vmul.f32 %v518_v19, %v492_v1  ;;  %704 = vmatpush.msrb.mxu2 %v687_v61  ;;  %v683_v1 = vld [vmem:[%s1892_s3 + $0xa8] sm:$0xff]  ;;  %v1242_v61 = vld [vmem:[%s1891_s2 + $0x1bb] ss:$0 sm:$0xff] }
 0x1d7   : > { %v540_v8 = vmul.f32 %v524_v0, %v515_v4  ;;  %v538_v13 = vmul.f32 %v522_v9, %v515_v4  ;;  %v536_v18 = vmul.f32 %v520_v14, %v515_v4  ;;  %v534_v23 = vmul.f32 %v518_v19, %v515_v4  ;;  %v684_v0 = vld [vmem:[%s1892_s3 + $0xd8] sm:$0xff] }
 0x1d8   : > { %1194 = vmatpush.xpose.msk.msrb.mxu3 %vm351_vm1, %v532_v6  ;;  %705 = vmatpush.msrb.mxu2 %v686_v62 }
 0x1d9   : > { %665 = vmatpush.msra.mxu1 %v540_v8 }
 0x1da   : > { %706 = vmatpush.msrb.mxu2 %v685_v63 }
 0x1db   : > { %666 = vmatpush.msra.mxu1 %v539_v10 }
 0x1dc   : > { %1195 = vmatpush.xpose.msk.msrb.mxu3 %vm351_vm1, %v531_v11  ;;  %707 = vmatpush.msrb.mxu2 %v684_v0 }
 0x1dd   : > { %667 = vmatpush.msra.mxu1 %v538_v13 }
 0x1de   : > { %708 = vmatpush.msrb.mxu2 %v683_v1 }
 0x1df   : > { %668 = vmatpush.msra.mxu1 %v537_v15  ;;  %v1240_v15 = vld [vmem:[%s1891_s2 + $0x1be] ss:$0 sm:$0xff] }
 0x1e0   : > { %1196 = vmatpush.xpose.msk.msrb.mxu3 %vm351_vm1, %v530_v16  ;;  %709 = vmatpush.msrb.mxu2 %v682_v2 }
 0x1e1   : > { %669 = vmatpush.msra.mxu1 %v536_v18 }
 0x1e2   : > { %710 = vmatpush.msrb.mxu2 %v681_v3 }
 0x1e3   : > { %670 = vmatpush.msra.mxu1 %v535_v20 }
 0x1e4   : > { %1197 = vmatpush.xpose.msk.msrb.mxu3 %vm351_vm1, %v529_v21  ;;  %711 = vmatpush.msrb.mxu2 %v680_v5 }
 0x1e5   : > { %671 = vmatpush.msra.mxu1 %v534_v23 }
 0x1e7   : > { %672 = vmatpush.msra.mxu1 %v533_v24 }
 0x1e8   : > { %1198 = vmatpush.xpose.msk.msrb.mxu3 %vm351_vm1, %v528_v25 }
 0x1ec   : > { %1199 = vmatpush.xpose.msk.msrb.mxu3 %vm351_vm1, %v527_v26 }
 0x1f0   : > { %1200 = vmatpush.xpose.msk.msrb.mxu3 %vm351_vm1, %v526_v27 }
 0x1f4   : > { %1201 = vmatpush.xpose.msk.msrb.mxu3 %vm351_vm1, %v525_v30 }
 0x1f7   : > { %1202 = vmatmul.msk.f32.vlgmr.msrb.gmra.mxu3 %vm351_vm1, %v466_v31 }
 0x1ff   : > { %1203 = vmatmul.msk.f32.gmra.mxu3 %vm351_vm1, %v469_v33  ;;  %v779_v33 = vld [vmem:[%s1892_s3 + $0x140] sm:$0xff] }
 0x27a   : > { %v590_v38 = vpop.f32.mrf.mxu3 }
 0x27b   : > { %v591_v39 = vadd.f32 %v590_v38, %v541_v37  ;;  %v775_v37 = vld [vmem:[%s1892_s3 + $0x80] sm:$0xff]  ;;  %v774_v38 = vld [vmem:[%s1892_s3 + $0x50] sm:$0xff] }
 0x27d   : > { %v596_v40 = vsel %vm351_vm1, %v591_v39, -inf }
 0x27e   : > { %597 = vmax.xlane.f32.xlu2 %v596_v40 }
 0x282   : > { %v593_v42 = vpop.f32.mrf.mxu3 }
 0x283   : > { %v594_v43 = vadd.f32 %v593_v42, %v542_v41 }
 0x285   : > { %v599_v44 = vsel %vm351_vm1, %v594_v43, -inf }
 0x286   : > { %600 = vmax.xlane.f32.xlu2 %v599_v44 }
 0x2f1   : > { %v598_v51 = vpop.xlane.xlu2 %597 }
 0x2f2   : > { %v602_v52 = vsub.f32 %v591_v39, %v598_v51  ;;  %v773_v39 = vld [vmem:[%s1892_s3 + $0x20] sm:$0xff] }
 0x2f4   : > { %v604_v53 = vmul.f32 1.442695, %v602_v52 }
 0x2f6   : > { %1252 = vpow2.f32 %v604_v53 }
 0x2f9   : > { %v601_v54 = vpop.xlane.xlu2 %600 }
 0x2fa   : > { %v603_v55 = vsub.f32 %v594_v43, %v601_v54 }
 0x2fc   : > { %v1253_v57 = vpop.eup %1252  ;;  %v606_v59 = vmul.f32 1.442695, %v603_v55  ;;  %v1241_v55 = vld [vmem:[%s1891_s2 + $0x1ba] ss:$0 sm:$0xff] }
 0x2fd   : > { %1204 = vmatmul.msk.f32.vlgmr.msrb.gmra.mxu0 %vm351_vm1, %v1253_v57 }
 0x2fe   : > { %1254 = vpow2.f32 %v606_v59 }
 0x304   : > { %v1255_v60 = vpop.eup %1254 }
 0x305   : > { %1205 = vmatmul.msk.f32.gmra.mxu0 %vm351_vm1, %v1255_v60 }
 0x37a   : > { %v639_v4 = vpop.f32.mrf.mxu0 }
 0x37b   : > { %v645_v6 = vmax.f32 %v639_v4, 1e-30 }
 0x37d   : > { %1256 = vrcp.f32 %v645_v6 }
 0x382   : > { %v642_v7 = vpop.f32.mrf.mxu0 }
 0x383   : > { %v1257_v8 = vpop.eup %1256  ;;  %v646_v9 = vmax.f32 %v642_v7, 1e-30  ;;  %v914_v7 = vld [vmem:[%s1891_s2 + $0x120] sm:$0xff] }
 0x384   : > { %v649_v10 = vmul.f32 %v1257_v8, %v1253_v57  ;;  %917 = vmatpush.msrb.mxu1 %v914_v7  ;;  %v913_v8 = vld [vmem:[%s1891_s2 + $0x118] sm:$0xff] }
 0x385   : > { %1258 = vrcp.f32 %v646_v9  ;;  %v912_v9 = vld [vmem:[%s1891_s2 + $0x110] sm:$0xff] }
 0x386   : > { %1206 = vmatmul.msk.f32.vlgmr.msra.gmra.mxu1 %vm351_vm1, %v649_v10  ;;  %v911_v10 = vld [vmem:[%s1891_s2 + $0x108] sm:$0xff] }
 0x387   : > { %918 = vmatpush.msrb.mxu1 %v913_v8 }
 0x389   : > { %919 = vmatpush.msrb.mxu1 %v912_v9 }
 0x38b   : > { %v1259_v11 = vpop.eup %1258  ;;  %920 = vmatpush.msrb.mxu1 %v911_v10 }
 0x38c   : > { %v650_v12 = vmul.f32 %v1259_v11, %v1255_v60  ;;  %v781_v11 = vld [vmem:[%s1892_s3 + $0x1a0] ss:$0 sm:$0xff] }
 0x38e   : > { %1207 = vmatmul.msk.f32.gmra.mxu1 %vm351_vm1, %v650_v12  ;;  %v910_v12 = vld [vmem:[%s1891_s2 + $0x100] sm:$0xff] }
 0x38f   : > { %921 = vmatpush.msrb.mxu1 %v910_v12 }
 0x403   : > { %v674_v13 = vpop.f32.mrf.mxu1 }
 0x404   : > { %1208 = vmatmul.msk.f32.vlgmr.msrb.gmra.mxu2 %vm351_vm1, %v674_v13 }
 0x40b   : > { %v677_v14 = vpop.f32.mrf.mxu1 }
 0x40c   : > { %1209 = vmatmul.msk.f32.gmra.mxu2 %vm351_vm1, %v677_v14 }
 0x487   : > { %v713_v16 = vpop.f32.mrf.mxu2 }
 0x488   : > { %v714_v17 = vadd.f32 %v1240_v15, %v713_v16 }
 0x48a   : > { %v719_v18 = vadd.f32 %v714_v17, %v1594_v46  ;;  %v908_v17 = vld [vmem:[%s1891_s2 + $0xf0] sm:$0xff] }
 0x48c   : > { %v723_v19 = vsel %vm351_vm1, %v719_v18, 0.0 }
 0x48d   : > { %724 = vadd.xlane.f32.xlu0 %v723_v19  ;;  %v907_v19 = vld [vmem:[%s1891_s2 + $0xe8] sm:$0xff] }
 0x48f   : > { %v716_v20 = vpop.f32.mrf.mxu2 }
 0x490   : > { %v717_v21 = vadd.f32 %v1240_v15, %v716_v20  ;;  %v909_v15 = vld [vmem:[%s1891_s2 + $0xf8] sm:$0xff] }
 0x491   : > { %922 = vmatpush.msrb.mxu1 %v909_v15 }
 0x492   : > { %v720_v22 = vadd.f32 %v717_v21, %v1603_v56  ;;  %v780_v56 = vld [vmem:[%s1892_s3 + $0x170] sm:$0xff]  ;;  %v906_v21 = vld [vmem:[%s1891_s2 + $0xe0] sm:$0xff] }
 0x493   : > { %796 = vmatpush.msra.mxu0 %v780_v56  ;;  %923 = vmatpush.msrb.mxu1 %v908_v17 }
 0x494   : > { %v726_v23 = vsel %vm351_vm1, %v720_v22, 0.0 }
 0x495   : > { %727 = vadd.xlane.f32.xlu1 %v726_v23  ;;  %797 = vmatpush.msra.mxu0 %v779_v33  ;;  %v902_v33 = vld [vmem:[%s1891_s2 + $0xc0] sm:$0xff] }
 0x496   : > { %924 = vmatpush.msrb.mxu1 %v907_v19 }
 0x497   : > { %798 = vmatpush.msra.mxu0 %v778_v34 }
 0x498   : > { %925 = vmatpush.msrb.mxu1 %v906_v21 }
 0x499   : > { %799 = vmatpush.msra.mxu0 %v777_v35  ;;  %v901_v35 = vld [vmem:[%s1891_s2 + $0xb8] sm:$0xff] }
 0x49b   : > { %800 = vmatpush.msra.mxu0 %v776_v36 }
 0x49d   : > { %801 = vmatpush.msra.mxu0 %v775_v37 }
 0x49f   : > { %802 = vmatpush.msra.mxu0 %v774_v38 }
 0x4a1   : > { %803 = vmatpush.msra.mxu0 %v773_v39  ;;  %v900_v39 = vld [vmem:[%s1891_s2 + $0xb0] sm:$0xff] }
 0x500   : > { %v725_v24 = vpop.xlane.xlu0 %724 }
 0x501   : > { %v729_v25 = vmul.f32 %v725_v24, %v1499_v58 }
 0x503   : > { %v731_v26 = vsub.f32 %v719_v18, %v729_v25 }
 0x505   : > { %v733_v27 = vmul.f32 %v731_v26, %v731_v26 }
 0x507   : > { %v735_v28 = vsel %vm351_vm1, %v733_v27, 0.0 }
 0x508   : > { %736 = vadd.xlane.f32.xlu2 %v735_v28  ;;  %v728_v29 = vpop.xlane.xlu1 %727 }
 0x509   : > { %v730_v46 = vmul.f32 %v728_v29, %v1499_v58  ;;  %v904_v29 = vld [vmem:[%s1891_s2 + $0xd0] sm:$0xff] }
 0x50b   : > { %v732_v30 = vsub.f32 %v720_v22, %v730_v46 }
 0x50d   : > { %v734_v31 = vmul.f32 %v732_v30, %v732_v30 }
 0x50f   : > { %v738_v32 = vsel %vm351_vm1, %v734_v31, 0.0 }
 0x510   : > { %739 = vadd.xlane.f32.xlu0 %v738_v32  ;;  %v903_v32 = vld [vmem:[%s1891_s2 + $0xc8] sm:$0xff] }
 0x57b   : > { %v737_v40 = vpop.xlane.xlu2 %736 }
 0x57c   : > { %v741_v41 = vmul.f32 %v737_v40, %v1499_v58 }
 0x57e   : > { %v743_v42 = vadd.f32 1e-05, %v741_v41 }
 0x580   : > { %1260 = vrsqrt.f32 %v743_v42  ;;  %vm751_vm10 = vweird.f32 %v743_v42 }
 0x583   : > { %v740_v43 = vpop.xlane.xlu0 %739 }
 0x584   : > { %v742_v44 = vmul.f32 %v740_v43, %v1499_v58  ;;  %v899_v43 = vld [vmem:[%s1891_s2 + $0xa8] sm:$0xff] }
 0x586   : > { %v1261_v45 = vpop.eup %1260  ;;  %v744_v47 = vadd.f32 1e-05, %v742_v44 }
 0x587   : > { %v746_v48 = vmul.f32 %v1261_v45, %v743_v42  ;;  %vm752_vm9 = vweird.f32 %v1261_v45 }
 0x588   : > { %1262 = vrsqrt.f32 %v744_v47  ;;  %vm753_vm11 = vmor %vm751_vm10, %vm752_vm9  ;;  %vm761_vm13 = vweird.f32 %v744_v47 }
 0x589   : > { %v747_v49 = vmul.f32 %v1261_v45, %v746_v48 }
 0x58b   : > { %v748_v50 = vmul.f32 0.5, %v747_v49 }
 0x58d   : > { %v749_v51 = vsub.f32 1.5, %v748_v50 }
 0x58e   : > { %v1263_v52 = vpop.eup %1262 }
 0x58f   : > { %v750_v53 = vmul.f32 %v1261_v45, %v749_v51  ;;  %v756_v54 = vmul.f32 %v1263_v52, %v744_v47  ;;  %vm762_vm12 = vweird.f32 %v1263_v52 }
 0x590   : > { %vm763_vm14 = vmor %vm761_vm13, %vm762_vm12 }
 0x591   : > { %v754_v57 = vsel %vm753_vm11, %v1261_v45, %v750_v53  ;;  %v757_v59 = vmul.f32 %v1263_v52, %v756_v54 }
 0x592   : > { %v765_v60 = vmul.f32 %v754_v57, %v731_v26  ;;  %v905_v26 = vld [vmem:[%s1891_s2 + $0xd8] sm:$0xff] }
 0x593   : > { %v758_v62 = vmul.f32 0.5, %v757_v59  ;;  %926 = vmatpush.msrb.mxu1 %v905_v26 }
 0x594   : > { %v768_v63 = vmul.f32 %v1241_v55, %v765_v60 }
 0x595   : > { %v759_v0 = vsub.f32 1.5, %v758_v62  ;;  %927 = vmatpush.msrb.mxu1 %v904_v29 }
 0x596   : > { %v1753_v1 = vadd.f32 %v1242_v61, %v768_v63 }
 0x597   : > { %v760_v2 = vmul.f32 %v1263_v52, %v759_v0  ;;  %928 = vmatpush.msrb.mxu1 %v903_v32 }
 0x598   : > { %1210 = vmatmul.msk.f32.vlgmr.msra.gmra.mxu0 %vm351_vm1, %v1753_v1 }
 0x599   : > { %v764_v3 = vsel %vm763_vm14, %v1263_v52, %v760_v2  ;;  %929 = vmatpush.msrb.mxu1 %v902_v33  ;;  %vm1035_vm14 = vcmask 1040384  }
 0x59a   : > { %v766_v4 = vmul.f32 %v764_v3, %v732_v30 }
 0x59b   : > { %930 = vmatpush.msrb.mxu1 %v901_v35 }
 0x59c   : > { %v769_v5 = vmul.f32 %v1241_v55, %v766_v4 }
 0x59d   : > { %931 = vmatpush.msrb.mxu1 %v900_v39 }
 0x59e   : > { %v1757_v6 = vadd.f32 %v1242_v61, %v769_v5 }
 0x59f   : > { %932 = vmatpush.msrb.mxu1 %v899_v43 }
 0x5a0   : > { %1211 = vmatmul.msk.f32.gmra.mxu0 %vm351_vm1, %v1757_v6 }
 0x615   : > { %v805_v13 = vpop.f32.mrf.mxu0 }
 0x616   : > { %v1779_v14 = vadd.f32 %v805_v13, %v781_v11 }
 0x618   : > { %v1785_v16 = vmul.f32 0.70710677, %v1779_v14 }
 0x61a   : > { %v815_v18 = vmul.f32 %v1785_v16, %v1785_v16 }
 0x61c   : > { %v816_v20 = vmin.f32 %v815_v18, 16.0 }
 0x61d   : > { %v808_v22 = vpop.f32.mrf.mxu0 }
 0x61e   : > { %v817_v23 = vmul.f32 2.1237322e-06, %v816_v20  ;;  %v828_v24 = vmul.f32 3.8918573e-05, %v816_v20  ;;  %v1798_v25 = vadd.f32 %v808_v22, %v781_v11 }
 0x620   : > { %v818_v27 = vadd.f32 0.00028619796, %v817_v23  ;;  %v829_v28 = vadd.f32 0.001143296, %v828_v24  ;;  %v1807_v46 = vmul.f32 0.70710677, %v1798_v25 }
 0x621   : > { %v812_v43 = vmul.f32 0.5, %v1798_v25 }
 0x622   : > { %v819_v30 = vmul.f32 %v818_v27, %v816_v20  ;;  %v830_v31 = vmul.f32 %v829_v28, %v816_v20  ;;  %v855_v56 = vmul.f32 %v1807_v46, %v1807_v46 }
 0x624   : > { %v831_v34 = vadd.f32 0.014752088, %v830_v31  ;;  %v820_v36 = vadd.f32 0.0036580483, %v819_v30  ;;  %v856_v37 = vmin.f32 %v855_v56, 16.0 }
 0x626   : > { %v832_v38 = vmul.f32 %v831_v34, %v816_v20  ;;  %v857_v40 = vmul.f32 2.1237322e-06, %v856_v37  ;;  %v868_v41 = vmul.f32 3.8918573e-05, %v856_v37  ;;  %v821_v44 = vmul.f32 %v820_v36, %v816_v20 }
 0x627   : > { %v811_v34 = vmul.f32 0.5, %v1779_v14  ;;  %v1243_v14 = vld [vmem:[%s1891_s2 + $0x1bf] ss:$0 sm:$0xff] }
 0x628   : > { %v833_v42 = vadd.f32 0.112945676, %v832_v38  ;;  %v858_v45 = vadd.f32 0.00028619796, %v857_v40  ;;  %v869_v47 = vadd.f32 0.001143296, %v868_v41 }
 0x629   : > { %v822_v52 = vadd.f32 0.05243302, %v821_v44 }
 0x62a   : > { %v834_v48 = vmul.f32 %v833_v42, %v816_v20  ;;  %v859_v49 = vmul.f32 %v858_v45, %v856_v37  ;;  %v870_v50 = vmul.f32 %v869_v47, %v856_v37 }
 0x62b   : > { %v823_v60 = vmul.f32 %v822_v52, %v816_v20 }
 0x62c   : > { %v835_v51 = vadd.f32 0.4994258, %v834_v48  ;;  %v871_v53 = vadd.f32 0.014752088, %v870_v50  ;;  %v860_v55 = vadd.f32 0.0036580483, %v859_v49 }
 0x62d   : > { %v824_v0 = vadd.f32 0.18741608, %v823_v60 }
 0x62e   : > { %v836_v54 = vmul.f32 %v835_v51, %v816_v20  ;;  %v872_v57 = vmul.f32 %v871_v53, %v856_v37  ;;  %v861_v62 = vmul.f32 %v860_v55, %v856_v37 }
 0x62f   : > { %v825_v7 = vmul.f32 %v824_v0, %v816_v20  ;;  %v1000_v0 = vld [vmem:[%s1892_s3 + $0x148] sm:$0xff] }
 0x630   : > { %v837_v59 = vadd.f32 1.0, %v836_v54  ;;  %v873_v61 = vadd.f32 0.112945676, %v872_v57  ;;  %v862_v3 = vadd.f32 0.05243302, %v861_v62 }
 0x631   : > { %v826_v13 = vadd.f32 1.1283791, %v825_v7  ;;  %v995_v7 = vld [vmem:[%s1892_s3 + $0x58] sm:$0xff] }
 0x632   : > { %1264 = vrcp.f32 %v837_v59  ;;  %v874_v63 = vmul.f32 %v873_v61, %v856_v37  ;;  %v863_v10 = vmul.f32 %v862_v3, %v856_v37  ;;  %v849_v12 = vand.u32 2147483648, %v837_v59  ;;  %v998_v3 = vld [vmem:[%s1892_s3 + $0xe8] sm:$0xff] }
 0x633   : > { %v847_v17 = vand.u32 2147483647, %v837_v59  ;;  %vm843_vm0 = vweird.f32 %v837_v59  ;;  %v827_v23 = vmul.f32 %v826_v13, %v1785_v16 }
 0x634   : > { %v875_v2 = vadd.f32 0.4994258, %v874_v63  ;;  %v864_v18 = vadd.f32 0.18741608, %v863_v10  ;;  %v850_v21 = vor.u32 1.1754944e-38, %v849_v12 }
 0x635   : > { %vm848_vm3 = vcmp.eq.f32.partialorder %v847_v17, 8.507059e+37 }
 0x636   : > { %v876_v4 = vmul.f32 %v875_v2, %v856_v37  ;;  %v865_v26 = vmul.f32 %v864_v18, %v856_v37  ;;  %v999_v2 = vld [vmem:[%s1892_s3 + $0x118] sm:$0xff] }
 0x638   : > { %v1265_v5 = vpop.eup %1264  ;;  %v877_v9 = vadd.f32 1.0, %v876_v4  ;;  %v866_v32 = vadd.f32 1.1283791, %v865_v26  ;;  %v997_v4 = vld [vmem:[%s1892_s3 + $0xb8] sm:$0xff] }
 0x639   : > { %v839_v8 = vmul.f32 %v1265_v5, %v837_v59  ;;  %vm844_vm15 = vweird.f32 %v1265_v5 }
 0x63a   : > { %1266 = vrcp.f32 %v877_v9  ;;  %vm845_vm2 = vmor %vm843_vm0, %vm844_vm15  ;;  %v889_v31 = vand.u32 2147483648, %v877_v9  ;;  %v887_v33 = vand.u32 2147483647, %v877_v9  ;;  %vm883_vm5 = vweird.f32 %v877_v9 }
 0x63b   : > { %v840_v11 = vsub.f32 1.0, %v839_v8  ;;  %v867_v39 = vmul.f32 %v866_v32, %v1807_v46  ;;  %v994_v8 = vld [vmem:[%s1892_s3 + $0x28] sm:$0xff] }
 0x63c   : > { %v890_v16 = vor.u32 1.1754944e-38, %v889_v31  ;;  %vm888_vm7 = vcmp.eq.f32.partialorder %v887_v33, 8.507059e+37 }
 0x63d   : > { %v841_v15 = vmul.f32 %v1265_v5, %v840_v11 }
 0x63f   : > { %v842_v19 = vadd.f32 %v1265_v5, %v841_v15 }
 0x640   : > { %v1267_v22 = vpop.eup %1266 }
 0x641   : > { %v846_v24 = vsel %vm845_vm2, %v1265_v5, %v842_v19  ;;  %v879_v27 = vmul.f32 %v1267_v22, %v877_v9  ;;  %vm884_vm4 = vweird.f32 %v1267_v22  ;;  %v996_v5 = vld [vmem:[%s1892_s3 + $0x88] sm:$0xff] }
 0x642   : > { %v851_v20 = vsel %vm848_vm3, %v850_v21, %v846_v24  ;;  %vm885_vm6 = vmor %vm883_vm5, %vm884_vm4 }
 0x643   : > { %v852_v28 = vmul.f32 %v851_v20, %v827_v23  ;;  %v880_v29 = vsub.f32 1.0, %v879_v27  ;;  %v1244_v20 = vld [vmem:[%s1891_s2 + $0x1bc] ss:$0 sm:$0xff] }
 0x645   : > { %v1212_v30 = vclamps-f32 %v852_v28, 1.0  ;;  %v881_v56 = vmul.f32 %v1267_v22, %v880_v29  ;;  %v1245_v29 = vld [vmem:[%s1891_s2 + $0x1bd] ss:$0 sm:$0xff] }
 0x647   : > { %v895_v35 = vadd.f32 1.0, %v1212_v30  ;;  %v882_v36 = vadd.f32 %v1267_v22, %v881_v56 }
 0x649   : > { %v897_v38 = vmul.f32 %v895_v35, %v811_v34  ;;  %v886_v37 = vsel %vm885_vm6, %v1267_v22, %v882_v36 }
 0x64a   : > { %v891_v40 = vsel %vm888_vm7, %v890_v16, %v886_v37  ;;  %v1309_v16 = vmov 2   ;;  %v1311_v37 = vmov 0  }
 0x64b   : > { %933 = vmatmul.f32.vlgmr.msrb.gmra.mxu1 %v897_v38  ;;  %v892_v41 = vmul.f32 %v891_v40, %v867_v39  ;;  %1236 = vset.pattern.permute.xlu1 %v1309_v16  ;;  %v1310_v39 = vmov 1  }
 0x64c   : > { %1235 = vset.pattern.permute.xlu0 %v1310_v39  ;;  %1234 = vset.pattern.permute.xlu2 %v1311_v37 }
 0x64d   : > { %v1213_v42 = vclamps-f32 %v892_v41, 1.0  ;;  %v1002_v41 = vld [vmem:[%s1892_s3 + $0x1a8] ss:$0 sm:$0xff] }
 0x64f   : > { %v896_v44 = vadd.f32 1.0, %v1213_v42 }
 0x651   : > { %v898_v45 = vmul.f32 %v896_v44, %v812_v43 }
 0x653   : > { %936 = vmatmul.f32.gmra.mxu1 %v898_v45 }
 0x6c8   : > { %v934_v47 = vpop.f32.mrf.mxu1 }
 0x6c9   : > { %v935_v48 = vadd.f32 %v1243_v14, %v934_v47 }
 0x6cb   : > { %v940_v49 = vadd.f32 %v935_v48, %v1753_v1  ;;  %v1037_v48 = vld [vmem:[%s180_s30] sm:$0x3] }
 0x6cd   : > { %v944_v46 = vsel %vm351_vm1, %v940_v49, 0.0 }
 0x6ce   : > { %945 = vadd.xlane.f32.xlu1 %v944_v46 }
 0x6d0   : > { %v937_v50 = vpop.f32.mrf.mxu1 }
 0x6d1   : > { %v938_v51 = vadd.f32 %v1243_v14, %v937_v50  ;;  %v1217_v50 = vld [vmem:[%s180_s30 + $0x4] sm:$0x3] }
 0x6d3   : > { %v941_v52 = vadd.f32 %v938_v51, %v1757_v6  ;;  %v1001_v6 = vld [vmem:[%s1892_s3 + $0x178] sm:$0xff] }
 0x6d4   : > { %1017 = vmatpush.msra.mxu2 %v1001_v6 }
 0x6d5   : > { %v947_v25 = vsel %vm351_vm1, %v941_v52, 0.0 }
 0x6d6   : > { %948 = vadd.xlane.f32.xlu2 %v947_v25  ;;  %1018 = vmatpush.msra.mxu2 %v1000_v0 }
 0x6d8   : > { %1019 = vmatpush.msra.mxu2 %v999_v2 }
 0x6da   : > { %1020 = vmatpush.msra.mxu2 %v998_v3 }
 0x6dc   : > { %1021 = vmatpush.msra.mxu2 %v997_v4 }
 0x6de   : > { %1022 = vmatpush.msra.mxu2 %v996_v5 }
 0x6e0   : > { %1023 = vmatpush.msra.mxu2 %v995_v7 }
 0x6e2   : > { %1024 = vmatpush.msra.mxu2 %v994_v8 }
 0x741   : > { %v946_v53 = vpop.xlane.xlu1 %945 }
 0x742   : > { %v950_v54 = vmul.f32 %v946_v53, %v1499_v58 }
 0x744   : > { %v952_v55 = vsub.f32 %v940_v49, %v950_v54  ;;  %v1216_v49 = vld [vmem:[%s180_s30 + $0x2] sm:$0x3] }
 0x746   : > { %v954_v57 = vmul.f32 %v952_v55, %v952_v55 }
 0x748   : > { %v956_v59 = vsel %vm351_vm1, %v954_v57, 0.0 }
 0x749   : > { %957 = vadd.xlane.f32.xlu0 %v956_v59  ;;  %v949_v60 = vpop.xlane.xlu2 %948 }
 0x74a   : > { %v951_v1 = vmul.f32 %v949_v60, %v1499_v58 }
 0x74c   : > { %v953_v61 = vsub.f32 %v941_v52, %v951_v1 }
 0x74e   : > { %v955_v62 = vmul.f32 %v953_v61, %v953_v61 }
 0x750   : > { %v959_v63 = vsel %vm351_vm1, %v955_v62, 0.0 }
 0x751   : > { %960 = vadd.xlane.f32.xlu1 %v959_v63 }
 0x7bc   : > { %v958_v9 = vpop.xlane.xlu0 %957 }
 0x7bd   : > { %v962_v10 = vmul.f32 %v958_v9, %v1499_v58 }
 0x7bf   : > { %v964_v11 = vadd.f32 1e-05, %v962_v10 }
 0x7c1   : > { %1268 = vrsqrt.f32 %v964_v11  ;;  %vm972_vm9 = vweird.f32 %v964_v11 }
 0x7c4   : > { %v961_v12 = vpop.xlane.xlu1 %960 }
 0x7c5   : > { %v963_v13 = vmul.f32 %v961_v12, %v1499_v58 }
 0x7c7   : > { %v1269_v15 = vpop.eup %1268  ;;  %v965_v18 = vadd.f32 1e-05, %v963_v13 }
 0x7c8   : > { %v967_v17 = vmul.f32 %v1269_v15, %v964_v11  ;;  %vm973_vm8 = vweird.f32 %v1269_v15 }
 0x7c9   : > { %1270 = vrsqrt.f32 %v965_v18  ;;  %vm974_vm10 = vmor %vm972_vm9, %vm973_vm8  ;;  %vm982_vm12 = vweird.f32 %v965_v18 }
 0x7ca   : > { %v968_v19 = vmul.f32 %v1269_v15, %v967_v17 }
 0x7cc   : > { %v969_v21 = vmul.f32 0.5, %v968_v19 }
 0x7ce   : > { %v970_v22 = vsub.f32 1.5, %v969_v21 }
 0x7cf   : > { %v1271_v23 = vpop.eup %1270 }
 0x7d0   : > { %v971_v24 = vmul.f32 %v1269_v15, %v970_v22  ;;  %v977_v26 = vmul.f32 %v1271_v23, %v965_v18  ;;  %vm983_vm11 = vweird.f32 %v1271_v23 }
 0x7d1   : > { %vm984_vm13 = vmor %vm982_vm12, %vm983_vm11 }
 0x7d2   : > { %v975_v27 = vsel %vm974_vm10, %v1269_v15, %v971_v24  ;;  %v978_v58 = vmul.f32 %v1271_v23, %v977_v26 }
 0x7d3   : > { %v986_v28 = vmul.f32 %v975_v27, %v952_v55 }
 0x7d4   : > { %v979_v31 = vmul.f32 0.5, %v978_v58 }
 0x7d5   : > { %v989_v30 = vmul.f32 %v1244_v20, %v986_v28 }
 0x7d6   : > { %v980_v32 = vsub.f32 1.5, %v979_v31 }
 0x7d7   : > { %v992_v56 = vadd.f32 %v1245_v29, %v989_v30 }
 0x7d8   : > { %v981_v33 = vmul.f32 %v1271_v23, %v980_v32 }
 0x7d9   : > { %1214 = vmatmul.msk.f32.vlgmr.msra.gmra.mxu2 %vm351_vm1, %v992_v56 }
 0x7da   : > { %v985_v34 = vsel %vm984_vm13, %v1271_v23, %v981_v33 }
 0x7db   : > { %v987_v35 = vmul.f32 %v985_v34, %v953_v61 }
 0x7dd   : > { %v990_v36 = vmul.f32 %v1244_v20, %v987_v35 }
 0x7df   : > { %v993_v38 = vadd.f32 %v1245_v29, %v990_v36 }
 0x7e1   : > { %1215 = vmatmul.msk.f32.gmra.mxu2 %vm351_vm1, %v993_v38  ;;  %vm1060_vm1 = vcmask 17408  }
 0x85c   : > { %v1026_v40 = vpop.f32.mrf.mxu2 }
 0x85d   : > { %v1027_v44 = vadd.f32 %v1026_v40, %v1002_v41 }
 0x864   : > { %v1029_v42 = vpop.f32.mrf.mxu2 }
 0x865   : > { %v1030_v43 = vadd.f32 %v1029_v42, %v1002_v41 }
 0x867   : > { %v1033_v45 = vrot.slane %v1030_v43, 7 }
 0x869   : > { %v1036_v14 = vsel %vm1035_vm14, %v1027_v44, %v1033_v45 }
 0x86a   : > { %1055 = vperm.xlu1 %1236, %v1036_v14   ;;  %1047 = vperm.xlu0 %1235, %v1036_v14  }
 0x86b   : > { %1040 = vperm.xlu2 %1234, %v1036_v14  }
 0x872   : > { %1237 = vset.pattern.permute.xlu0 %v1309_v16 }
 0x8c5   : > { %v1041_v47 = vpop.permute.xlu2 %1040 }
 0x8c6   : > { %v1043_v52 = vmul.f32 %v1041_v47, %v1037_v48 }
 0x8dc   : > { %v1056_v46 = vpop.permute.xlu1 %1055  ;;  %v1048_v51 = vpop.permute.xlu0 %1047 }
 0x8dd   : > { %v1050_v25 = vmul.f32 %v1216_v49, %v1048_v51  ;;  %v1058_v53 = vmul.f32 %v1217_v50, %v1056_v46 }
 0x8df   : > { %v1051_v54 = vadd.f32 %v1050_v25, %v1043_v52 }
 0x8e1   : > { %v1059_v55 = vadd.f32 %v1058_v53, %v1051_v54 }
 0x8e3   : > { %1061 = vst.msk [vmem:[%s185_s29] sm:$0x3] %vm1060_vm1, %v1059_v55 }
 0x8e4 PF: > { %s28_s26 = sadd.s32 1, %s1304_s26  }
 0x8e5   : > { %p25_p5 = scmp.ge.s32.totalorder %s28_s26, 10  }
 0x8e7   :  { %27 = sbr.rel (!%p25_p5) target bundleno = 8 (0x8), region = 97 }

</bundles_post_ra>
